<compile_context>
chip_gen: v7x
topology: tpu7x:2x2x1
jax: 0.10.0
libtpu: 0.0.40
codegen_flags: <defaults>
</compile_context>

<pallas_src>
import functools

import jax
import jax.numpy as jnp
import numpy as np
from jax.experimental import pallas as pl
from jax.experimental.pallas import tpu as pltpu


def _round_up(x, m):
    return ((x + m - 1) // m) * m


# ----------------------------------------------------------------------------
# Pallas kernel: in-kernel token gather + LSTM recurrence + linear head
# ----------------------------------------------------------------------------
def _lstm_classifier_kernel(ids_ref, table_ref, whh_ref, wout_ref, bout_ref,
                            out_ref, gx_ref, *, B, T, H):
    Bp = out_ref.shape[0]          # padded batch (multiple of 8 sublanes)
    G = 4 * H                      # packed gate width (128 lanes for H=32)

    # ---- Token gather: gx[t*Bp + b] = table[token] --------------------------
    # ids are (B, T); the PyTorch `.view(T, B, -1)` is a reshape, so flat
    # element m of the (B*T) embedding rows lands at (t_seq, b_seq) = (m//B, m%B).
    gx_ref[...] = jnp.zeros_like(gx_ref)       # padded batch rows stay exactly 0
    # TODO(synk): switch this static Python loop to lax.fori_loop for large B*T.
    for m in range(B * T):
        tok = ids_ref[m // T, m % T]                       # scalar id from SMEM
        n = (m // B) * Bp + (m % B)                        # static destination row
        gx_ref[pl.ds(n, 1), :] = table_ref[pl.ds(tok, 1), :]

    # ---- LSTM recurrence -----------------------------------------------------
    whh = whh_ref[...]                                     # (H, 4H) bf16, hoisted
    lane = jax.lax.broadcasted_iota(jnp.int32, (Bp, G), 1)
    g_mask = (lane >= 2 * H) & (lane < 3 * H)              # tanh lanes of packed gates

    def step(t, carry):
        h, c = carry                                       # (Bp, H) f32 each
        start = pl.multiple_of(t * Bp, Bp)
        gates = gx_ref[pl.ds(start, Bp), :] + jnp.dot(
            h.astype(jnp.bfloat16), whh,
            preferred_element_type=jnp.float32)            # (Bp, 4H) f32
        # One sigmoid + one tanh pass over the full packed 128-lane block,
        # then select the g-gate lanes; slices below are static lane slices.
        sig = jax.nn.sigmoid(gates)
        th = jnp.tanh(gates)
        act = jnp.where(g_mask, th, sig)
        i_g = act[:, 0 * H:1 * H]
        f_g = act[:, 1 * H:2 * H]
        g_g = act[:, 2 * H:3 * H]
        o_g = act[:, 3 * H:4 * H]
        c_new = f_g * c + i_g * g_g
        h_new = o_g * jnp.tanh(c_new)
        return (h_new, c_new)

    # PyTorch default: zero initial hidden/cell state; carried in vregs.
    h0 = jnp.zeros((Bp, H), jnp.float32)
    c0 = jnp.zeros((Bp, H), jnp.float32)
    h_last, _ = jax.lax.fori_loop(0, T, step, (h0, c0), unroll=min(T, 8))

    # ---- Fused linear head on the last hidden state (lane-dense store) ------
    out_ref[...] = (jnp.dot(h_last.astype(jnp.bfloat16), wout_ref[...],
                            preferred_element_type=jnp.float32)
                    + bout_ref[...]).astype(out_ref.dtype)


# ----------------------------------------------------------------------------
# One-time parameter prep + jitted forward
# ----------------------------------------------------------------------------
def make_author_classifier(params):
    """Prepares fused/padded weights ONCE and returns forward(batch)->(B, A)."""
    H = int(params["weight_hh_l0"].shape[1])
    A = int(params["linear_weight"].shape[0])
    V = int(params["embedding"].shape[0])
    G = 4 * H
    Ap = _round_up(A, 128)     # lane-dense output store
    Vp = _round_up(V, 8)       # sublane-align the fused table

    # Exact algebraic fusion of embedding @ W_ih^T (+ combined bias), done once.
    table = jnp.dot(params["embedding"], params["weight_ih_l0"].T,
                    precision=jax.lax.Precision.HIGHEST)
    table = table + (params["bias_ih_l0"] + params["bias_hh_l0"])[None, :]
    table = jnp.pad(table, ((0, Vp - V), (0, 0))).astype(jnp.float32)        # (Vp, 4H)
    w_hh_t = params["weight_hh_l0"].T.astype(jnp.bfloat16)                   # (H, 4H)
    w_out_t = jnp.pad(params["linear_weight"].T,
                      ((0, 0), (0, Ap - A))).astype(jnp.bfloat16)            # (H, Ap)
    b_out = jnp.pad(params["linear_bias"][None, :],
                    ((0, 0), (0, Ap - A))).astype(jnp.float32)               # (1, Ap)

    @jax.jit
    def forward(batch):
        B, T = batch.shape
        Bp = _round_up(B, 8)
        # TODO(synk): for very large T, chunk the gx cache over time (bf16 /
        # double-buffered) and for large B add a batch grid axis (v7x 2nd TC).
        cost = pl.CostEstimate(
            flops=2 * T * Bp * H * G + 2 * Bp * H * Ap,
            transcendentals=T * Bp * (2 * G + H),
            bytes_accessed=(batch.size * 4 + table.size * 4 + w_hh_t.size * 2
                            + w_out_t.size * 2 + b_out.size * 4 + Bp * Ap * 4))
        kernel = functools.partial(_lstm_classifier_kernel, B=B, T=T, H=H)
        out = pl.pallas_call(
            kernel,
            out_shape=jax.ShapeDtypeStruct((Bp, Ap), jnp.float32),
            in_specs=[
                pl.BlockSpec(memory_space=pltpu.MemorySpace.SMEM),   # token ids
                pl.BlockSpec(memory_space=pltpu.MemorySpace.VMEM),   # fused (V,4H) table
                pl.BlockSpec(memory_space=pltpu.MemorySpace.VMEM),   # W_hh^T (bf16)
                pl.BlockSpec(memory_space=pltpu.MemorySpace.VMEM),   # W_out^T (bf16)
                pl.BlockSpec(memory_space=pltpu.MemorySpace.VMEM),   # b_out
            ],
            out_specs=pl.BlockSpec(memory_space=pltpu.MemorySpace.VMEM),
            scratch_shapes=[pltpu.VMEM((T * Bp, G), jnp.float32)],   # gx cache
            cost_estimate=cost,
        )(batch.astype(jnp.int32), table, w_hh_t, w_out_t, b_out)
        return out[:B, :A]

    return forward


# ----------------------------------------------------------------------------
# Pure-JAX reference (mirrors torch semantics) for a correctness check
# ----------------------------------------------------------------------------
def reference_forward(batch, params):
    emb = jnp.take(params["embedding"], batch, axis=0)
    B, T = batch.shape
    x_seq = emb.reshape(T, B, -1)
    H = params["weight_hh_l0"].shape[1]
    w_ih = params["weight_ih_l0"]
    w_hh = params["weight_hh_l0"]
    b = params["bias_ih_l0"] + params["bias_hh_l0"]

    def step(carry, x_t):
        h, c = carry
        gates = x_t @ w_ih.T + h @ w_hh.T + b
        i = jax.nn.sigmoid(gates[:, 0 * H:1 * H])
        f = jax.nn.sigmoid(gates[:, 1 * H:2 * H])
        g = jnp.tanh(gates[:, 2 * H:3 * H])
        o = jax.nn.sigmoid(gates[:, 3 * H:4 * H])
        c = f * c + i * g
        h = o * jnp.tanh(c)
        return (h, c), h

    (h, _), _ = jax.lax.scan(
        step, (jnp.zeros((B, H), jnp.float32), jnp.zeros((B, H), jnp.float32)),
        x_seq)
    return h @ params["linear_weight"].T + params["linear_bias"]


# ----------------------------------------------------------------------------
if __name__ == "__main__":
    NUM_AUTHORS = 8
    VOCAB_SIZE = 50
    EMBED_DIM = 32
    HIDDEN_DIM = 32
    B, T = 4, 8          # batch of token sequences, shape (B, T)

    key = jax.random.PRNGKey(0)
    k = jax.random.split(key, 8)
    scale = 0.1
    params = {
        "embedding":     scale * jax.random.normal(k[0], (VOCAB_SIZE, EMBED_DIM), jnp.float32),
        "weight_ih_l0":  scale * jax.random.normal(k[1], (4 * HIDDEN_DIM, EMBED_DIM), jnp.float32),
        "weight_hh_l0":  scale * jax.random.normal(k[2], (4 * HIDDEN_DIM, HIDDEN_DIM), jnp.float32),
        "bias_ih_l0":    scale * jax.random.normal(k[3], (4 * HIDDEN_DIM,), jnp.float32),
        "bias_hh_l0":    scale * jax.random.normal(k[4], (4 * HIDDEN_DIM,), jnp.float32),
        "linear_weight": scale * jax.random.normal(k[5], (NUM_AUTHORS, HIDDEN_DIM), jnp.float32),
        "linear_bias":   scale * jax.random.normal(k[6], (NUM_AUTHORS,), jnp.float32),
    }
    batch = jax.random.randint(k[7], (B, T), 0, VOCAB_SIZE, dtype=jnp.int32)

    forward = make_author_classifier(params)     # one-time weight prep
    out = jax.block_until_ready(forward(batch))

    ref = jax.block_until_ready(reference_forward(batch, params))
    np.testing.assert_allclose(np.asarray(out), np.asarray(ref),
                               atol=1e-2, rtol=1e-2)

    assert out.shape == (B, NUM_AUTHORS)
    print("KERNEL_OK")
</pallas_src>

<mosaic_0001>
module attributes {stable_mosaic.version = 11 : i64} {
  func.func @_lstm_classifier_kernel(%arg0: memref<4x8xi32, #tpu.memory_space<smem>>, %arg1: memref<56x128xf32, #tpu.memory_space<vmem>>, %arg2: memref<32x128xbf16, #tpu.memory_space<vmem>>, %arg3: memref<32x128xbf16, #tpu.memory_space<vmem>>, %arg4: memref<1x128xf32, #tpu.memory_space<vmem>>, %arg5: memref<8x128xf32, #tpu.memory_space<vmem>>, %arg6: memref<64x128xf32, #tpu.memory_space<vmem>>) attributes {dimension_semantics = [], scalar_prefetch = 0 : i64, scratch_operands = 1 : i64, tpu.core_type = #tpu.core_type<tc>} {
    %cst = arith.constant 0.000000e+00 : f32
    %0 = vector.broadcast %cst : f32 to vector<64x128xf32>
    %c0 = arith.constant 0 : index
    %c0_0 = arith.constant 0 : index
    %1 = vector.load %arg6[%c0, %c0_0] : memref<64x128xf32, #tpu.memory_space<vmem>>, vector<64x128xf32>
    tpu.vector_store %arg6[%c0, %c0_0], %0 {strides = array<i32>} : memref<64x128xf32, #tpu.memory_space<vmem>>, vector<64x128xf32>,
    %c0_1 = arith.constant 0 : index
    %c0_2 = arith.constant 0 : index
    %2 = memref.load %arg0[%c0_1, %c0_2] : memref<4x8xi32, #tpu.memory_space<smem>>
    %3 = arith.index_cast %2 : i32 to index
    %c0_3 = arith.constant 0 : index
    %4 = vector.load %arg1[%3, %c0_3] : memref<56x128xf32, #tpu.memory_space<vmem>>, vector<1x128xf32>
    %c0_4 = arith.constant 0 : index
    %c0_5 = arith.constant 0 : index
    %5 = vector.load %arg6[%c0_4, %c0_5] : memref<64x128xf32, #tpu.memory_space<vmem>>, vector<1x128xf32>
    tpu.vector_store %arg6[%c0_4, %c0_5], %4 {strides = array<i32>} : memref<64x128xf32, #tpu.memory_space<vmem>>, vector<1x128xf32>,
    %c0_6 = arith.constant 0 : index
    %c1 = arith.constant 1 : index
    %6 = memref.load %arg0[%c0_6, %c1] : memref<4x8xi32, #tpu.memory_space<smem>>
    %7 = arith.index_cast %6 : i32 to index
    %c0_7 = arith.constant 0 : index
    %8 = vector.load %arg1[%7, %c0_7] : memref<56x128xf32, #tpu.memory_space<vmem>>, vector<1x128xf32>
    %c1_8 = arith.constant 1 : index
    %c0_9 = arith.constant 0 : index
    %9 = vector.load %arg6[%c1_8, %c0_9] : memref<64x128xf32, #tpu.memory_space<vmem>>, vector<1x128xf32>
    tpu.vector_store %arg6[%c1_8, %c0_9], %8 {strides = array<i32>} : memref<64x128xf32, #tpu.memory_space<vmem>>, vector<1x128xf32>,
    %c0_10 = arith.constant 0 : index
    %c2 = arith.constant 2 : index
    %10 = memref.load %arg0[%c0_10, %c2] : memref<4x8xi32, #tpu.memory_space<smem>>
    %11 = arith.index_cast %10 : i32 to index
    %c0_11 = arith.constant 0 : index
    %12 = vector.load %arg1[%11, %c0_11] : memref<56x128xf32, #tpu.memory_space<vmem>>, vector<1x128xf32>
    %c2_12 = arith.constant 2 : index
    %c0_13 = arith.constant 0 : index
    %13 = vector.load %arg6[%c2_12, %c0_13] : memref<64x128xf32, #tpu.memory_space<vmem>>, vector<1x128xf32>
    tpu.vector_store %arg6[%c2_12, %c0_13], %12 {strides = array<i32>} : memref<64x128xf32, #tpu.memory_space<vmem>>, vector<1x128xf32>,
    %c0_14 = arith.constant 0 : index
    %c3 = arith.constant 3 : index
    %14 = memref.load %arg0[%c0_14, %c3] : memref<4x8xi32, #tpu.memory_space<smem>>
    %15 = arith.index_cast %14 : i32 to index
    %c0_15 = arith.constant 0 : index
    %16 = vector.load %arg1[%15, %c0_15] : memref<56x128xf32, #tpu.memory_space<vmem>>, vector<1x128xf32>
    %c3_16 = arith.constant 3 : index
    %c0_17 = arith.constant 0 : index
    %17 = vector.load %arg6[%c3_16, %c0_17] : memref<64x128xf32, #tpu.memory_space<vmem>>, vector<1x128xf32>
    tpu.vector_store %arg6[%c3_16, %c0_17], %16 {strides = array<i32>} : memref<64x128xf32, #tpu.memory_space<vmem>>, vector<1x128xf32>,
    %c0_18 = arith.constant 0 : index
    %c4 = arith.constant 4 : index
    %18 = memref.load %arg0[%c0_18, %c4] : memref<4x8xi32, #tpu.memory_space<smem>>
    %19 = arith.index_cast %18 : i32 to index
    %c0_19 = arith.constant 0 : index
    %20 = vector.load %arg1[%19, %c0_19] : memref<56x128xf32, #tpu.memory_space<vmem>>, vector<1x128xf32>
    %c8 = arith.constant 8 : index
    %c0_20 = arith.constant 0 : index
    %21 = vector.load %arg6[%c8, %c0_20] : memref<64x128xf32, #tpu.memory_space<vmem>>, vector<1x128xf32>
    tpu.vector_store %arg6[%c8, %c0_20], %20 {strides = array<i32>} : memref<64x128xf32, #tpu.memory_space<vmem>>, vector<1x128xf32>,
    %c0_21 = arith.constant 0 : index
    %c5 = arith.constant 5 : index
    %22 = memref.load %arg0[%c0_21, %c5] : memref<4x8xi32, #tpu.memory_space<smem>>
    %23 = arith.index_cast %22 : i32 to index
    %c0_22 = arith.constant 0 : index
    %24 = vector.load %arg1[%23, %c0_22] : memref<56x128xf32, #tpu.memory_space<vmem>>, vector<1x128xf32>
    %c9 = arith.constant 9 : index
    %c0_23 = arith.constant 0 : index
    %25 = vector.load %arg6[%c9, %c0_23] : memref<64x128xf32, #tpu.memory_space<vmem>>, vector<1x128xf32>
    tpu.vector_store %arg6[%c9, %c0_23], %24 {strides = array<i32>} : memref<64x128xf32, #tpu.memory_space<vmem>>, vector<1x128xf32>,
    %c0_24 = arith.constant 0 : index
    %c6 = arith.constant 6 : index
    %26 = memref.load %arg0[%c0_24, %c6] : memref<4x8xi32, #tpu.memory_space<smem>>
    %27 = arith.index_cast %26 : i32 to index
    %c0_25 = arith.constant 0 : index
    %28 = vector.load %arg1[%27, %c0_25] : memref<56x128xf32, #tpu.memory_space<vmem>>, vector<1x128xf32>
    %c10 = arith.constant 10 : index
    %c0_26 = arith.constant 0 : index
    %29 = vector.load %arg6[%c10, %c0_26] : memref<64x128xf32, #tpu.memory_space<vmem>>, vector<1x128xf32>
    tpu.vector_store %arg6[%c10, %c0_26], %28 {strides = array<i32>} : memref<64x128xf32, #tpu.memory_space<vmem>>, vector<1x128xf32>,
    %c0_27 = arith.constant 0 : index
    %c7 = arith.constant 7 : index
    %30 = memref.load %arg0[%c0_27, %c7] : memref<4x8xi32, #tpu.memory_space<smem>>
    %31 = arith.index_cast %30 : i32 to index
    %c0_28 = arith.constant 0 : index
    %32 = vector.load %arg1[%31, %c0_28] : memref<56x128xf32, #tpu.memory_space<vmem>>, vector<1x128xf32>
    %c11 = arith.constant 11 : index
    %c0_29 = arith.constant 0 : index
    %33 = vector.load %arg6[%c11, %c0_29] : memref<64x128xf32, #tpu.memory_space<vmem>>, vector<1x128xf32>
    tpu.vector_store %arg6[%c11, %c0_29], %32 {strides = array<i32>} : memref<64x128xf32, #tpu.memory_space<vmem>>, vector<1x128xf32>,
    %c1_30 = arith.constant 1 : index
    %c0_31 = arith.constant 0 : index
    %34 = memref.load %arg0[%c1_30, %c0_31] : memref<4x8xi32, #tpu.memory_space<smem>>
    %35 = arith.index_cast %34 : i32 to index
    %c0_32 = arith.constant 0 : index
    %36 = vector.load %arg1[%35, %c0_32] : memref<56x128xf32, #tpu.memory_space<vmem>>, vector<1x128xf32>
    %c16 = arith.constant 16 : index
    %c0_33 = arith.constant 0 : index
    %37 = vector.load %arg6[%c16, %c0_33] : memref<64x128xf32, #tpu.memory_space<vmem>>, vector<1x128xf32>
    tpu.vector_store %arg6[%c16, %c0_33], %36 {strides = array<i32>} : memref<64x128xf32, #tpu.memory_space<vmem>>, vector<1x128xf32>,
    %c1_34 = arith.constant 1 : index
    %c1_35 = arith.constant 1 : index
    %38 = memref.load %arg0[%c1_34, %c1_35] : memref<4x8xi32, #tpu.memory_space<smem>>
    %39 = arith.index_cast %38 : i32 to index
    %c0_36 = arith.constant 0 : index
    %40 = vector.load %arg1[%39, %c0_36] : memref<56x128xf32, #tpu.memory_space<vmem>>, vector<1x128xf32>
    %c17 = arith.constant 17 : index
    %c0_37 = arith.constant 0 : index
    %41 = vector.load %arg6[%c17, %c0_37] : memref<64x128xf32, #tpu.memory_space<vmem>>, vector<1x128xf32>
    tpu.vector_store %arg6[%c17, %c0_37], %40 {strides = array<i32>} : memref<64x128xf32, #tpu.memory_space<vmem>>, vector<1x128xf32>,
    %c1_38 = arith.constant 1 : index
    %c2_39 = arith.constant 2 : index
    %42 = memref.load %arg0[%c1_38, %c2_39] : memref<4x8xi32, #tpu.memory_space<smem>>
    %43 = arith.index_cast %42 : i32 to index
    %c0_40 = arith.constant 0 : index
    %44 = vector.load %arg1[%43, %c0_40] : memref<56x128xf32, #tpu.memory_space<vmem>>, vector<1x128xf32>
    %c18 = arith.constant 18 : index
    %c0_41 = arith.constant 0 : index
    %45 = vector.load %arg6[%c18, %c0_41] : memref<64x128xf32, #tpu.memory_space<vmem>>, vector<1x128xf32>
    tpu.vector_store %arg6[%c18, %c0_41], %44 {strides = array<i32>} : memref<64x128xf32, #tpu.memory_space<vmem>>, vector<1x128xf32>,
    %c1_42 = arith.constant 1 : index
    %c3_43 = arith.constant 3 : index
    %46 = memref.load %arg0[%c1_42, %c3_43] : memref<4x8xi32, #tpu.memory_space<smem>>
    %47 = arith.index_cast %46 : i32 to index
    %c0_44 = arith.constant 0 : index
    %48 = vector.load %arg1[%47, %c0_44] : memref<56x128xf32, #tpu.memory_space<vmem>>, vector<1x128xf32>
    %c19 = arith.constant 19 : index
    %c0_45 = arith.constant 0 : index
    %49 = vector.load %arg6[%c19, %c0_45] : memref<64x128xf32, #tpu.memory_space<vmem>>, vector<1x128xf32>
    tpu.vector_store %arg6[%c19, %c0_45], %48 {strides = array<i32>} : memref<64x128xf32, #tpu.memory_space<vmem>>, vector<1x128xf32>,
    %c1_46 = arith.constant 1 : index
    %c4_47 = arith.constant 4 : index
    %50 = memref.load %arg0[%c1_46, %c4_47] : memref<4x8xi32, #tpu.memory_space<smem>>
    %51 = arith.index_cast %50 : i32 to index
    %c0_48 = arith.constant 0 : index
    %52 = vector.load %arg1[%51, %c0_48] : memref<56x128xf32, #tpu.memory_space<vmem>>, vector<1x128xf32>
    %c24 = arith.constant 24 : index
    %c0_49 = arith.constant 0 : index
    %53 = vector.load %arg6[%c24, %c0_49] : memref<64x128xf32, #tpu.memory_space<vmem>>, vector<1x128xf32>
    tpu.vector_store %arg6[%c24, %c0_49], %52 {strides = array<i32>} : memref<64x128xf32, #tpu.memory_space<vmem>>, vector<1x128xf32>,
    %c1_50 = arith.constant 1 : index
    %c5_51 = arith.constant 5 : index
    %54 = memref.load %arg0[%c1_50, %c5_51] : memref<4x8xi32, #tpu.memory_space<smem>>
    %55 = arith.index_cast %54 : i32 to index
    %c0_52 = arith.constant 0 : index
    %56 = vector.load %arg1[%55, %c0_52] : memref<56x128xf32, #tpu.memory_space<vmem>>, vector<1x128xf32>
    %c25 = arith.constant 25 : index
    %c0_53 = arith.constant 0 : index
    %57 = vector.load %arg6[%c25, %c0_53] : memref<64x128xf32, #tpu.memory_space<vmem>>, vector<1x128xf32>
    tpu.vector_store %arg6[%c25, %c0_53], %56 {strides = array<i32>} : memref<64x128xf32, #tpu.memory_space<vmem>>, vector<1x128xf32>,
    %c1_54 = arith.constant 1 : index
    %c6_55 = arith.constant 6 : index
    %58 = memref.load %arg0[%c1_54, %c6_55] : memref<4x8xi32, #tpu.memory_space<smem>>
    %59 = arith.index_cast %58 : i32 to index
    %c0_56 = arith.constant 0 : index
    %60 = vector.load %arg1[%59, %c0_56] : memref<56x128xf32, #tpu.memory_space<vmem>>, vector<1x128xf32>
    %c26 = arith.constant 26 : index
    %c0_57 = arith.constant 0 : index
    %61 = vector.load %arg6[%c26, %c0_57] : memref<64x128xf32, #tpu.memory_space<vmem>>, vector<1x128xf32>
    tpu.vector_store %arg6[%c26, %c0_57], %60 {strides = array<i32>} : memref<64x128xf32, #tpu.memory_space<vmem>>, vector<1x128xf32>,
    %c1_58 = arith.constant 1 : index
    %c7_59 = arith.constant 7 : index
    %62 = memref.load %arg0[%c1_58, %c7_59] : memref<4x8xi32, #tpu.memory_space<smem>>
    %63 = arith.index_cast %62 : i32 to index
    %c0_60 = arith.constant 0 : index
    %64 = vector.load %arg1[%63, %c0_60] : memref<56x128xf32, #tpu.memory_space<vmem>>, vector<1x128xf32>
    %c27 = arith.constant 27 : index
    %c0_61 = arith.constant 0 : index
    %65 = vector.load %arg6[%c27, %c0_61] : memref<64x128xf32, #tpu.memory_space<vmem>>, vector<1x128xf32>
    tpu.vector_store %arg6[%c27, %c0_61], %64 {strides = array<i32>} : memref<64x128xf32, #tpu.memory_space<vmem>>, vector<1x128xf32>,
    %c2_62 = arith.constant 2 : index
    %c0_63 = arith.constant 0 : index
    %66 = memref.load %arg0[%c2_62, %c0_63] : memref<4x8xi32, #tpu.memory_space<smem>>
    %67 = arith.index_cast %66 : i32 to index
    %c0_64 = arith.constant 0 : index
    %68 = vector.load %arg1[%67, %c0_64] : memref<56x128xf32, #tpu.memory_space<vmem>>, vector<1x128xf32>
    %c32 = arith.constant 32 : index
    %c0_65 = arith.constant 0 : index
    %69 = vector.load %arg6[%c32, %c0_65] : memref<64x128xf32, #tpu.memory_space<vmem>>, vector<1x128xf32>
    tpu.vector_store %arg6[%c32, %c0_65], %68 {strides = array<i32>} : memref<64x128xf32, #tpu.memory_space<vmem>>, vector<1x128xf32>,
    %c2_66 = arith.constant 2 : index
    %c1_67 = arith.constant 1 : index
    %70 = memref.load %arg0[%c2_66, %c1_67] : memref<4x8xi32, #tpu.memory_space<smem>>
    %71 = arith.index_cast %70 : i32 to index
    %c0_68 = arith.constant 0 : index
    %72 = vector.load %arg1[%71, %c0_68] : memref<56x128xf32, #tpu.memory_space<vmem>>, vector<1x128xf32>
    %c33 = arith.constant 33 : index
    %c0_69 = arith.constant 0 : index
    %73 = vector.load %arg6[%c33, %c0_69] : memref<64x128xf32, #tpu.memory_space<vmem>>, vector<1x128xf32>
    tpu.vector_store %arg6[%c33, %c0_69], %72 {strides = array<i32>} : memref<64x128xf32, #tpu.memory_space<vmem>>, vector<1x128xf32>,
    %c2_70 = arith.constant 2 : index
    %c2_71 = arith.constant 2 : index
    %74 = memref.load %arg0[%c2_70, %c2_71] : memref<4x8xi32, #tpu.memory_space<smem>>
    %75 = arith.index_cast %74 : i32 to index
    %c0_72 = arith.constant 0 : index
    %76 = vector.load %arg1[%75, %c0_72] : memref<56x128xf32, #tpu.memory_space<vmem>>, vector<1x128xf32>
    %c34 = arith.constant 34 : index
    %c0_73 = arith.constant 0 : index
    %77 = vector.load %arg6[%c34, %c0_73] : memref<64x128xf32, #tpu.memory_space<vmem>>, vector<1x128xf32>
    tpu.vector_store %arg6[%c34, %c0_73], %76 {strides = array<i32>} : memref<64x128xf32, #tpu.memory_space<vmem>>, vector<1x128xf32>,
    %c2_74 = arith.constant 2 : index
    %c3_75 = arith.constant 3 : index
    %78 = memref.load %arg0[%c2_74, %c3_75] : memref<4x8xi32, #tpu.memory_space<smem>>
    %79 = arith.index_cast %78 : i32 to index
    %c0_76 = arith.constant 0 : index
    %80 = vector.load %arg1[%79, %c0_76] : memref<56x128xf32, #tpu.memory_space<vmem>>, vector<1x128xf32>
    %c35 = arith.constant 35 : index
    %c0_77 = arith.constant 0 : index
    %81 = vector.load %arg6[%c35, %c0_77] : memref<64x128xf32, #tpu.memory_space<vmem>>, vector<1x128xf32>
    tpu.vector_store %arg6[%c35, %c0_77], %80 {strides = array<i32>} : memref<64x128xf32, #tpu.memory_space<vmem>>, vector<1x128xf32>,
    %c2_78 = arith.constant 2 : index
    %c4_79 = arith.constant 4 : index
    %82 = memref.load %arg0[%c2_78, %c4_79] : memref<4x8xi32, #tpu.memory_space<smem>>
    %83 = arith.index_cast %82 : i32 to index
    %c0_80 = arith.constant 0 : index
    %84 = vector.load %arg1[%83, %c0_80] : memref<56x128xf32, #tpu.memory_space<vmem>>, vector<1x128xf32>
    %c40 = arith.constant 40 : index
    %c0_81 = arith.constant 0 : index
    %85 = vector.load %arg6[%c40, %c0_81] : memref<64x128xf32, #tpu.memory_space<vmem>>, vector<1x128xf32>
    tpu.vector_store %arg6[%c40, %c0_81], %84 {strides = array<i32>} : memref<64x128xf32, #tpu.memory_space<vmem>>, vector<1x128xf32>,
    %c2_82 = arith.constant 2 : index
    %c5_83 = arith.constant 5 : index
    %86 = memref.load %arg0[%c2_82, %c5_83] : memref<4x8xi32, #tpu.memory_space<smem>>
    %87 = arith.index_cast %86 : i32 to index
    %c0_84 = arith.constant 0 : index
    %88 = vector.load %arg1[%87, %c0_84] : memref<56x128xf32, #tpu.memory_space<vmem>>, vector<1x128xf32>
    %c41 = arith.constant 41 : index
    %c0_85 = arith.constant 0 : index
    %89 = vector.load %arg6[%c41, %c0_85] : memref<64x128xf32, #tpu.memory_space<vmem>>, vector<1x128xf32>
    tpu.vector_store %arg6[%c41, %c0_85], %88 {strides = array<i32>} : memref<64x128xf32, #tpu.memory_space<vmem>>, vector<1x128xf32>,
    %c2_86 = arith.constant 2 : index
    %c6_87 = arith.constant 6 : index
    %90 = memref.load %arg0[%c2_86, %c6_87] : memref<4x8xi32, #tpu.memory_space<smem>>
    %91 = arith.index_cast %90 : i32 to index
    %c0_88 = arith.constant 0 : index
    %92 = vector.load %arg1[%91, %c0_88] : memref<56x128xf32, #tpu.memory_space<vmem>>, vector<1x128xf32>
    %c42 = arith.constant 42 : index
    %c0_89 = arith.constant 0 : index
    %93 = vector.load %arg6[%c42, %c0_89] : memref<64x128xf32, #tpu.memory_space<vmem>>, vector<1x128xf32>
    tpu.vector_store %arg6[%c42, %c0_89], %92 {strides = array<i32>} : memref<64x128xf32, #tpu.memory_space<vmem>>, vector<1x128xf32>,
    %c2_90 = arith.constant 2 : index
    %c7_91 = arith.constant 7 : index
    %94 = memref.load %arg0[%c2_90, %c7_91] : memref<4x8xi32, #tpu.memory_space<smem>>
    %95 = arith.index_cast %94 : i32 to index
    %c0_92 = arith.constant 0 : index
    %96 = vector.load %arg1[%95, %c0_92] : memref<56x128xf32, #tpu.memory_space<vmem>>, vector<1x128xf32>
    %c43 = arith.constant 43 : index
    %c0_93 = arith.constant 0 : index
    %97 = vector.load %arg6[%c43, %c0_93] : memref<64x128xf32, #tpu.memory_space<vmem>>, vector<1x128xf32>
    tpu.vector_store %arg6[%c43, %c0_93], %96 {strides = array<i32>} : memref<64x128xf32, #tpu.memory_space<vmem>>, vector<1x128xf32>,
    %c3_94 = arith.constant 3 : index
    %c0_95 = arith.constant 0 : index
    %98 = memref.load %arg0[%c3_94, %c0_95] : memref<4x8xi32, #tpu.memory_space<smem>>
    %99 = arith.index_cast %98 : i32 to index
    %c0_96 = arith.constant 0 : index
    %100 = vector.load %arg1[%99, %c0_96] : memref<56x128xf32, #tpu.memory_space<vmem>>, vector<1x128xf32>
    %c48 = arith.constant 48 : index
    %c0_97 = arith.constant 0 : index
    %101 = vector.load %arg6[%c48, %c0_97] : memref<64x128xf32, #tpu.memory_space<vmem>>, vector<1x128xf32>
    tpu.vector_store %arg6[%c48, %c0_97], %100 {strides = array<i32>} : memref<64x128xf32, #tpu.memory_space<vmem>>, vector<1x128xf32>,
    %c3_98 = arith.constant 3 : index
    %c1_99 = arith.constant 1 : index
    %102 = memref.load %arg0[%c3_98, %c1_99] : memref<4x8xi32, #tpu.memory_space<smem>>
    %103 = arith.index_cast %102 : i32 to index
    %c0_100 = arith.constant 0 : index
    %104 = vector.load %arg1[%103, %c0_100] : memref<56x128xf32, #tpu.memory_space<vmem>>, vector<1x128xf32>
    %c49 = arith.constant 49 : index
    %c0_101 = arith.constant 0 : index
    %105 = vector.load %arg6[%c49, %c0_101] : memref<64x128xf32, #tpu.memory_space<vmem>>, vector<1x128xf32>
    tpu.vector_store %arg6[%c49, %c0_101], %104 {strides = array<i32>} : memref<64x128xf32, #tpu.memory_space<vmem>>, vector<1x128xf32>,
    %c3_102 = arith.constant 3 : index
    %c2_103 = arith.constant 2 : index
    %106 = memref.load %arg0[%c3_102, %c2_103] : memref<4x8xi32, #tpu.memory_space<smem>>
    %107 = arith.index_cast %106 : i32 to index
    %c0_104 = arith.constant 0 : index
    %108 = vector.load %arg1[%107, %c0_104] : memref<56x128xf32, #tpu.memory_space<vmem>>, vector<1x128xf32>
    %c50 = arith.constant 50 : index
    %c0_105 = arith.constant 0 : index
    %109 = vector.load %arg6[%c50, %c0_105] : memref<64x128xf32, #tpu.memory_space<vmem>>, vector<1x128xf32>
    tpu.vector_store %arg6[%c50, %c0_105], %108 {strides = array<i32>} : memref<64x128xf32, #tpu.memory_space<vmem>>, vector<1x128xf32>,
    %c3_106 = arith.constant 3 : index
    %c3_107 = arith.constant 3 : index
    %110 = memref.load %arg0[%c3_106, %c3_107] : memref<4x8xi32, #tpu.memory_space<smem>>
    %111 = arith.index_cast %110 : i32 to index
    %c0_108 = arith.constant 0 : index
    %112 = vector.load %arg1[%111, %c0_108] : memref<56x128xf32, #tpu.memory_space<vmem>>, vector<1x128xf32>
    %c51 = arith.constant 51 : index
    %c0_109 = arith.constant 0 : index
    %113 = vector.load %arg6[%c51, %c0_109] : memref<64x128xf32, #tpu.memory_space<vmem>>, vector<1x128xf32>
    tpu.vector_store %arg6[%c51, %c0_109], %112 {strides = array<i32>} : memref<64x128xf32, #tpu.memory_space<vmem>>, vector<1x128xf32>,
    %c3_110 = arith.constant 3 : index
    %c4_111 = arith.constant 4 : index
    %114 = memref.load %arg0[%c3_110, %c4_111] : memref<4x8xi32, #tpu.memory_space<smem>>
    %115 = arith.index_cast %114 : i32 to index
    %c0_112 = arith.constant 0 : index
    %116 = vector.load %arg1[%115, %c0_112] : memref<56x128xf32, #tpu.memory_space<vmem>>, vector<1x128xf32>
    %c56 = arith.constant 56 : index
    %c0_113 = arith.constant 0 : index
    %117 = vector.load %arg6[%c56, %c0_113] : memref<64x128xf32, #tpu.memory_space<vmem>>, vector<1x128xf32>
    tpu.vector_store %arg6[%c56, %c0_113], %116 {strides = array<i32>} : memref<64x128xf32, #tpu.memory_space<vmem>>, vector<1x128xf32>,
    %c3_114 = arith.constant 3 : index
    %c5_115 = arith.constant 5 : index
    %118 = memref.load %arg0[%c3_114, %c5_115] : memref<4x8xi32, #tpu.memory_space<smem>>
    %119 = arith.index_cast %118 : i32 to index
    %c0_116 = arith.constant 0 : index
    %120 = vector.load %arg1[%119, %c0_116] : memref<56x128xf32, #tpu.memory_space<vmem>>, vector<1x128xf32>
    %c57 = arith.constant 57 : index
    %c0_117 = arith.constant 0 : index
    %121 = vector.load %arg6[%c57, %c0_117] : memref<64x128xf32, #tpu.memory_space<vmem>>, vector<1x128xf32>
    tpu.vector_store %arg6[%c57, %c0_117], %120 {strides = array<i32>} : memref<64x128xf32, #tpu.memory_space<vmem>>, vector<1x128xf32>,
    %c3_118 = arith.constant 3 : index
    %c6_119 = arith.constant 6 : index
    %122 = memref.load %arg0[%c3_118, %c6_119] : memref<4x8xi32, #tpu.memory_space<smem>>
    %123 = arith.index_cast %122 : i32 to index
    %c0_120 = arith.constant 0 : index
    %124 = vector.load %arg1[%123, %c0_120] : memref<56x128xf32, #tpu.memory_space<vmem>>, vector<1x128xf32>
    %c58 = arith.constant 58 : index
    %c0_121 = arith.constant 0 : index
    %125 = vector.load %arg6[%c58, %c0_121] : memref<64x128xf32, #tpu.memory_space<vmem>>, vector<1x128xf32>
    tpu.vector_store %arg6[%c58, %c0_121], %124 {strides = array<i32>} : memref<64x128xf32, #tpu.memory_space<vmem>>, vector<1x128xf32>,
    %c3_122 = arith.constant 3 : index
    %c7_123 = arith.constant 7 : index
    %126 = memref.load %arg0[%c3_122, %c7_123] : memref<4x8xi32, #tpu.memory_space<smem>>
    %127 = arith.index_cast %126 : i32 to index
    %c0_124 = arith.constant 0 : index
    %128 = vector.load %arg1[%127, %c0_124] : memref<56x128xf32, #tpu.memory_space<vmem>>, vector<1x128xf32>
    %c59 = arith.constant 59 : index
    %c0_125 = arith.constant 0 : index
    %129 = vector.load %arg6[%c59, %c0_125] : memref<64x128xf32, #tpu.memory_space<vmem>>, vector<1x128xf32>
    tpu.vector_store %arg6[%c59, %c0_125], %128 {strides = array<i32>} : memref<64x128xf32, #tpu.memory_space<vmem>>, vector<1x128xf32>,
    %c0_126 = arith.constant 0 : index
    %c0_127 = arith.constant 0 : index
    %130 = vector.load %arg2[%c0_126, %c0_127] : memref<32x128xbf16, #tpu.memory_space<vmem>>, vector<32x128xbf16>
    %131 = tpu.iota {dimensions = array<i32: 1>} : vector<8x128xi32>
    %c64_i32 = arith.constant 64 : i32
    %132 = vector.broadcast %c64_i32 : i32 to vector<8x128xi32>
    %133 = arith.cmpi sge, %131, %132 : vector<8x128xi32>
    %c96_i32 = arith.constant 96 : i32
    %134 = vector.broadcast %c96_i32 : i32 to vector<8x128xi32>
    %135 = arith.cmpi slt, %131, %134 : vector<8x128xi32>
    %136 = arith.andi %133, %135 : vector<8x128xi1>
    %cst_128 = arith.constant 0.000000e+00 : f32
    %137 = vector.broadcast %cst_128 : f32 to vector<8x32xf32>
    %cst_129 = arith.constant 0.000000e+00 : f32
    %138 = vector.broadcast %cst_129 : f32 to vector<8x32xf32>
    %c0_i32 = arith.constant 0 : i32
    %c8_i32 = arith.constant 8 : i32
    %139 = arith.muli %c0_i32, %c8_i32 : i32
    %140 = tpu.assume_multiple %139, 8 : i32
    %141 = arith.index_cast %140 : i32 to index
    %c0_130 = arith.constant 0 : index
    %142 = vector.load %arg6[%141, %c0_130] : memref<64x128xf32, #tpu.memory_space<vmem>>, vector<8x128xf32>
    %143 = arith.truncf %137 : vector<8x32xf32> to vector<8x32xbf16>
    %cst_131 = arith.constant dense<0.000000e+00> : vector<8x128xf32>
    %144 = tpu.matmul %143, %130, %cst_131 {dimension_numbers = #tpu.dot_dimension_numbers<[1], [0], [0], [1], [0, 0, 1, 1], [], []>} : vector<8x32xbf16>, vector<32x128xbf16>, vector<8x128xf32> -> vector<8x128xf32>
    %145 = arith.addf %142, %144 : vector<8x128xf32>
    %146 = arith.negf %145 : vector<8x128xf32>
    %147 = math.exp %146 : vector<8x128xf32>
    %cst_132 = arith.constant 1.000000e+00 : f32
    %148 = vector.broadcast %cst_132 : f32 to vector<8x128xf32>
    %149 = arith.addf %148, %147 : vector<8x128xf32>
    %150 = arith.divf %148, %149 : vector<8x128xf32>
    %151 = math.tanh %145 : vector<8x128xf32>
    %152 = arith.select %136, %151, %150 : vector<8x128xi1>, vector<8x128xf32>
    %153 = vector.extract_strided_slice %152 {offsets = [0, 0], sizes = [8, 32], strides = [1, 1]} : vector<8x128xf32> to vector<8x32xf32>
    %154 = vector.extract_strided_slice %152 {offsets = [0, 32], sizes = [8, 32], strides = [1, 1]} : vector<8x128xf32> to vector<8x32xf32>
    %155 = vector.extract_strided_slice %152 {offsets = [0, 64], sizes = [8, 32], strides = [1, 1]} : vector<8x128xf32> to vector<8x32xf32>
    %156 = vector.extract_strided_slice %152 {offsets = [0, 96], sizes = [8, 32], strides = [1, 1]} : vector<8x128xf32> to vector<8x32xf32>
    %157 = arith.mulf %154, %138 : vector<8x32xf32>
    %158 = arith.mulf %153, %155 : vector<8x32xf32>
    %159 = arith.addf %157, %158 : vector<8x32xf32>
    %160 = math.tanh %159 : vector<8x32xf32>
    %161 = arith.mulf %156, %160 : vector<8x32xf32>
    %c1_i32 = arith.constant 1 : i32
    %c8_i32_133 = arith.constant 8 : i32
    %162 = arith.muli %c1_i32, %c8_i32_133 : i32
    %163 = tpu.assume_multiple %162, 8 : i32
    %164 = arith.index_cast %163 : i32 to index
    %c0_134 = arith.constant 0 : index
    %165 = vector.load %arg6[%164, %c0_134] : memref<64x128xf32, #tpu.memory_space<vmem>>, vector<8x128xf32>
    %166 = arith.truncf %161 : vector<8x32xf32> to vector<8x32xbf16>
    %cst_135 = arith.constant dense<0.000000e+00> : vector<8x128xf32>
    %167 = tpu.matmul %166, %130, %cst_135 {dimension_numbers = #tpu.dot_dimension_numbers<[1], [0], [0], [1], [0, 0, 1, 1], [], []>} : vector<8x32xbf16>, vector<32x128xbf16>, vector<8x128xf32> -> vector<8x128xf32>
    %168 = arith.addf %165, %167 : vector<8x128xf32>
    %169 = arith.negf %168 : vector<8x128xf32>
    %170 = math.exp %169 : vector<8x128xf32>
    %cst_136 = arith.constant 1.000000e+00 : f32
    %171 = vector.broadcast %cst_136 : f32 to vector<8x128xf32>
    %172 = arith.addf %171, %170 : vector<8x128xf32>
    %173 = arith.divf %171, %172 : vector<8x128xf32>
    %174 = math.tanh %168 : vector<8x128xf32>
    %175 = arith.select %136, %174, %173 : vector<8x128xi1>, vector<8x128xf32>
    %176 = vector.extract_strided_slice %175 {offsets = [0, 0], sizes = [8, 32], strides = [1, 1]} : vector<8x128xf32> to vector<8x32xf32>
    %177 = vector.extract_strided_slice %175 {offsets = [0, 32], sizes = [8, 32], strides = [1, 1]} : vector<8x128xf32> to vector<8x32xf32>
    %178 = vector.extract_strided_slice %175 {offsets = [0, 64], sizes = [8, 32], strides = [1, 1]} : vector<8x128xf32> to vector<8x32xf32>
    %179 = vector.extract_strided_slice %175 {offsets = [0, 96], sizes = [8, 32], strides = [1, 1]} : vector<8x128xf32> to vector<8x32xf32>
    %180 = arith.mulf %177, %159 : vector<8x32xf32>
    %181 = arith.mulf %176, %178 : vector<8x32xf32>
    %182 = arith.addf %180, %181 : vector<8x32xf32>
    %183 = math.tanh %182 : vector<8x32xf32>
    %184 = arith.mulf %179, %183 : vector<8x32xf32>
    %c2_i32 = arith.constant 2 : i32
    %c8_i32_137 = arith.constant 8 : i32
    %185 = arith.muli %c2_i32, %c8_i32_137 : i32
    %186 = tpu.assume_multiple %185, 8 : i32
    %187 = arith.index_cast %186 : i32 to index
    %c0_138 = arith.constant 0 : index
    %188 = vector.load %arg6[%187, %c0_138] : memref<64x128xf32, #tpu.memory_space<vmem>>, vector<8x128xf32>
    %189 = arith.truncf %184 : vector<8x32xf32> to vector<8x32xbf16>
    %cst_139 = arith.constant dense<0.000000e+00> : vector<8x128xf32>
    %190 = tpu.matmul %189, %130, %cst_139 {dimension_numbers = #tpu.dot_dimension_numbers<[1], [0], [0], [1], [0, 0, 1, 1], [], []>} : vector<8x32xbf16>, vector<32x128xbf16>, vector<8x128xf32> -> vector<8x128xf32>
    %191 = arith.addf %188, %190 : vector<8x128xf32>
    %192 = arith.negf %191 : vector<8x128xf32>
    %193 = math.exp %192 : vector<8x128xf32>
    %cst_140 = arith.constant 1.000000e+00 : f32
    %194 = vector.broadcast %cst_140 : f32 to vector<8x128xf32>
    %195 = arith.addf %194, %193 : vector<8x128xf32>
    %196 = arith.divf %194, %195 : vector<8x128xf32>
    %197 = math.tanh %191 : vector<8x128xf32>
    %198 = arith.select %136, %197, %196 : vector<8x128xi1>, vector<8x128xf32>
    %199 = vector.extract_strided_slice %198 {offsets = [0, 0], sizes = [8, 32], strides = [1, 1]} : vector<8x128xf32> to vector<8x32xf32>
    %200 = vector.extract_strided_slice %198 {offsets = [0, 32], sizes = [8, 32], strides = [1, 1]} : vector<8x128xf32> to vector<8x32xf32>
    %201 = vector.extract_strided_slice %198 {offsets = [0, 64], sizes = [8, 32], strides = [1, 1]} : vector<8x128xf32> to vector<8x32xf32>
    %202 = vector.extract_strided_slice %198 {offsets = [0, 96], sizes = [8, 32], strides = [1, 1]} : vector<8x128xf32> to vector<8x32xf32>
    %203 = arith.mulf %200, %182 : vector<8x32xf32>
    %204 = arith.mulf %199, %201 : vector<8x32xf32>
    %205 = arith.addf %203, %204 : vector<8x32xf32>
    %206 = math.tanh %205 : vector<8x32xf32>
    %207 = arith.mulf %202, %206 : vector<8x32xf32>
    %c3_i32 = arith.constant 3 : i32
    %c8_i32_141 = arith.constant 8 : i32
    %208 = arith.muli %c3_i32, %c8_i32_141 : i32
    %209 = tpu.assume_multiple %208, 8 : i32
    %210 = arith.index_cast %209 : i32 to index
    %c0_142 = arith.constant 0 : index
    %211 = vector.load %arg6[%210, %c0_142] : memref<64x128xf32, #tpu.memory_space<vmem>>, vector<8x128xf32>
    %212 = arith.truncf %207 : vector<8x32xf32> to vector<8x32xbf16>
    %cst_143 = arith.constant dense<0.000000e+00> : vector<8x128xf32>
    %213 = tpu.matmul %212, %130, %cst_143 {dimension_numbers = #tpu.dot_dimension_numbers<[1], [0], [0], [1], [0, 0, 1, 1], [], []>} : vector<8x32xbf16>, vector<32x128xbf16>, vector<8x128xf32> -> vector<8x128xf32>
    %214 = arith.addf %211, %213 : vector<8x128xf32>
    %215 = arith.negf %214 : vector<8x128xf32>
    %216 = math.exp %215 : vector<8x128xf32>
    %cst_144 = arith.constant 1.000000e+00 : f32
    %217 = vector.broadcast %cst_144 : f32 to vector<8x128xf32>
    %218 = arith.addf %217, %216 : vector<8x128xf32>
    %219 = arith.divf %217, %218 : vector<8x128xf32>
    %220 = math.tanh %214 : vector<8x128xf32>
    %221 = arith.select %136, %220, %219 : vector<8x128xi1>, vector<8x128xf32>
    %222 = vector.extract_strided_slice %221 {offsets = [0, 0], sizes = [8, 32], strides = [1, 1]} : vector<8x128xf32> to vector<8x32xf32>
    %223 = vector.extract_strided_slice %221 {offsets = [0, 32], sizes = [8, 32], strides = [1, 1]} : vector<8x128xf32> to vector<8x32xf32>
    %224 = vector.extract_strided_slice %221 {offsets = [0, 64], sizes = [8, 32], strides = [1, 1]} : vector<8x128xf32> to vector<8x32xf32>
    %225 = vector.extract_strided_slice %221 {offsets = [0, 96], sizes = [8, 32], strides = [1, 1]} : vector<8x128xf32> to vector<8x32xf32>
    %226 = arith.mulf %223, %205 : vector<8x32xf32>
    %227 = arith.mulf %222, %224 : vector<8x32xf32>
    %228 = arith.addf %226, %227 : vector<8x32xf32>
    %229 = math.tanh %228 : vector<8x32xf32>
    %230 = arith.mulf %225, %229 : vector<8x32xf32>
    %c4_i32 = arith.constant 4 : i32
    %c8_i32_145 = arith.constant 8 : i32
    %231 = arith.muli %c4_i32, %c8_i32_145 : i32
    %232 = tpu.assume_multiple %231, 8 : i32
    %233 = arith.index_cast %232 : i32 to index
    %c0_146 = arith.constant 0 : index
    %234 = vector.load %arg6[%233, %c0_146] : memref<64x128xf32, #tpu.memory_space<vmem>>, vector<8x128xf32>
    %235 = arith.truncf %230 : vector<8x32xf32> to vector<8x32xbf16>
    %cst_147 = arith.constant dense<0.000000e+00> : vector<8x128xf32>
    %236 = tpu.matmul %235, %130, %cst_147 {dimension_numbers = #tpu.dot_dimension_numbers<[1], [0], [0], [1], [0, 0, 1, 1], [], []>} : vector<8x32xbf16>, vector<32x128xbf16>, vector<8x128xf32> -> vector<8x128xf32>
    %237 = arith.addf %234, %236 : vector<8x128xf32>
    %238 = arith.negf %237 : vector<8x128xf32>
    %239 = math.exp %238 : vector<8x128xf32>
    %cst_148 = arith.constant 1.000000e+00 : f32
    %240 = vector.broadcast %cst_148 : f32 to vector<8x128xf32>
    %241 = arith.addf %240, %239 : vector<8x128xf32>
    %242 = arith.divf %240, %241 : vector<8x128xf32>
    %243 = math.tanh %237 : vector<8x128xf32>
    %244 = arith.select %136, %243, %242 : vector<8x128xi1>, vector<8x128xf32>
    %245 = vector.extract_strided_slice %244 {offsets = [0, 0], sizes = [8, 32], strides = [1, 1]} : vector<8x128xf32> to vector<8x32xf32>
    %246 = vector.extract_strided_slice %244 {offsets = [0, 32], sizes = [8, 32], strides = [1, 1]} : vector<8x128xf32> to vector<8x32xf32>
    %247 = vector.extract_strided_slice %244 {offsets = [0, 64], sizes = [8, 32], strides = [1, 1]} : vector<8x128xf32> to vector<8x32xf32>
    %248 = vector.extract_strided_slice %244 {offsets = [0, 96], sizes = [8, 32], strides = [1, 1]} : vector<8x128xf32> to vector<8x32xf32>
    %249 = arith.mulf %246, %228 : vector<8x32xf32>
    %250 = arith.mulf %245, %247 : vector<8x32xf32>
    %251 = arith.addf %249, %250 : vector<8x32xf32>
    %252 = math.tanh %251 : vector<8x32xf32>
    %253 = arith.mulf %248, %252 : vector<8x32xf32>
    %c5_i32 = arith.constant 5 : i32
    %c8_i32_149 = arith.constant 8 : i32
    %254 = arith.muli %c5_i32, %c8_i32_149 : i32
    %255 = tpu.assume_multiple %254, 8 : i32
    %256 = arith.index_cast %255 : i32 to index
    %c0_150 = arith.constant 0 : index
    %257 = vector.load %arg6[%256, %c0_150] : memref<64x128xf32, #tpu.memory_space<vmem>>, vector<8x128xf32>
    %258 = arith.truncf %253 : vector<8x32xf32> to vector<8x32xbf16>
    %cst_151 = arith.constant dense<0.000000e+00> : vector<8x128xf32>
    %259 = tpu.matmul %258, %130, %cst_151 {dimension_numbers = #tpu.dot_dimension_numbers<[1], [0], [0], [1], [0, 0, 1, 1], [], []>} : vector<8x32xbf16>, vector<32x128xbf16>, vector<8x128xf32> -> vector<8x128xf32>
    %260 = arith.addf %257, %259 : vector<8x128xf32>
    %261 = arith.negf %260 : vector<8x128xf32>
    %262 = math.exp %261 : vector<8x128xf32>
    %cst_152 = arith.constant 1.000000e+00 : f32
    %263 = vector.broadcast %cst_152 : f32 to vector<8x128xf32>
    %264 = arith.addf %263, %262 : vector<8x128xf32>
    %265 = arith.divf %263, %264 : vector<8x128xf32>
    %266 = math.tanh %260 : vector<8x128xf32>
    %267 = arith.select %136, %266, %265 : vector<8x128xi1>, vector<8x128xf32>
    %268 = vector.extract_strided_slice %267 {offsets = [0, 0], sizes = [8, 32], strides = [1, 1]} : vector<8x128xf32> to vector<8x32xf32>
    %269 = vector.extract_strided_slice %267 {offsets = [0, 32], sizes = [8, 32], strides = [1, 1]} : vector<8x128xf32> to vector<8x32xf32>
    %270 = vector.extract_strided_slice %267 {offsets = [0, 64], sizes = [8, 32], strides = [1, 1]} : vector<8x128xf32> to vector<8x32xf32>
    %271 = vector.extract_strided_slice %267 {offsets = [0, 96], sizes = [8, 32], strides = [1, 1]} : vector<8x128xf32> to vector<8x32xf32>
    %272 = arith.mulf %269, %251 : vector<8x32xf32>
    %273 = arith.mulf %268, %270 : vector<8x32xf32>
    %274 = arith.addf %272, %273 : vector<8x32xf32>
    %275 = math.tanh %274 : vector<8x32xf32>
    %276 = arith.mulf %271, %275 : vector<8x32xf32>
    %c6_i32 = arith.constant 6 : i32
    %c8_i32_153 = arith.constant 8 : i32
    %277 = arith.muli %c6_i32, %c8_i32_153 : i32
    %278 = tpu.assume_multiple %277, 8 : i32
    %279 = arith.index_cast %278 : i32 to index
    %c0_154 = arith.constant 0 : index
    %280 = vector.load %arg6[%279, %c0_154] : memref<64x128xf32, #tpu.memory_space<vmem>>, vector<8x128xf32>
    %281 = arith.truncf %276 : vector<8x32xf32> to vector<8x32xbf16>
    %cst_155 = arith.constant dense<0.000000e+00> : vector<8x128xf32>
    %282 = tpu.matmul %281, %130, %cst_155 {dimension_numbers = #tpu.dot_dimension_numbers<[1], [0], [0], [1], [0, 0, 1, 1], [], []>} : vector<8x32xbf16>, vector<32x128xbf16>, vector<8x128xf32> -> vector<8x128xf32>
    %283 = arith.addf %280, %282 : vector<8x128xf32>
    %284 = arith.negf %283 : vector<8x128xf32>
    %285 = math.exp %284 : vector<8x128xf32>
    %cst_156 = arith.constant 1.000000e+00 : f32
    %286 = vector.broadcast %cst_156 : f32 to vector<8x128xf32>
    %287 = arith.addf %286, %285 : vector<8x128xf32>
    %288 = arith.divf %286, %287 : vector<8x128xf32>
    %289 = math.tanh %283 : vector<8x128xf32>
    %290 = arith.select %136, %289, %288 : vector<8x128xi1>, vector<8x128xf32>
    %291 = vector.extract_strided_slice %290 {offsets = [0, 0], sizes = [8, 32], strides = [1, 1]} : vector<8x128xf32> to vector<8x32xf32>
    %292 = vector.extract_strided_slice %290 {offsets = [0, 32], sizes = [8, 32], strides = [1, 1]} : vector<8x128xf32> to vector<8x32xf32>
    %293 = vector.extract_strided_slice %290 {offsets = [0, 64], sizes = [8, 32], strides = [1, 1]} : vector<8x128xf32> to vector<8x32xf32>
    %294 = vector.extract_strided_slice %290 {offsets = [0, 96], sizes = [8, 32], strides = [1, 1]} : vector<8x128xf32> to vector<8x32xf32>
    %295 = arith.mulf %292, %274 : vector<8x32xf32>
    %296 = arith.mulf %291, %293 : vector<8x32xf32>
    %297 = arith.addf %295, %296 : vector<8x32xf32>
    %298 = math.tanh %297 : vector<8x32xf32>
    %299 = arith.mulf %294, %298 : vector<8x32xf32>
    %c7_i32 = arith.constant 7 : i32
    %c8_i32_157 = arith.constant 8 : i32
    %300 = arith.muli %c7_i32, %c8_i32_157 : i32
    %301 = tpu.assume_multiple %300, 8 : i32
    %302 = arith.index_cast %301 : i32 to index
    %c0_158 = arith.constant 0 : index
    %303 = vector.load %arg6[%302, %c0_158] : memref<64x128xf32, #tpu.memory_space<vmem>>, vector<8x128xf32>
    %304 = arith.truncf %299 : vector<8x32xf32> to vector<8x32xbf16>
    %cst_159 = arith.constant dense<0.000000e+00> : vector<8x128xf32>
    %305 = tpu.matmul %304, %130, %cst_159 {dimension_numbers = #tpu.dot_dimension_numbers<[1], [0], [0], [1], [0, 0, 1, 1], [], []>} : vector<8x32xbf16>, vector<32x128xbf16>, vector<8x128xf32> -> vector<8x128xf32>
    %306 = arith.addf %303, %305 : vector<8x128xf32>
    %307 = arith.negf %306 : vector<8x128xf32>
    %308 = math.exp %307 : vector<8x128xf32>
    %cst_160 = arith.constant 1.000000e+00 : f32
    %309 = vector.broadcast %cst_160 : f32 to vector<8x128xf32>
    %310 = arith.addf %309, %308 : vector<8x128xf32>
    %311 = arith.divf %309, %310 : vector<8x128xf32>
    %312 = math.tanh %306 : vector<8x128xf32>
    %313 = arith.select %136, %312, %311 : vector<8x128xi1>, vector<8x128xf32>
    %314 = vector.extract_strided_slice %313 {offsets = [0, 0], sizes = [8, 32], strides = [1, 1]} : vector<8x128xf32> to vector<8x32xf32>
    %315 = vector.extract_strided_slice %313 {offsets = [0, 32], sizes = [8, 32], strides = [1, 1]} : vector<8x128xf32> to vector<8x32xf32>
    %316 = vector.extract_strided_slice %313 {offsets = [0, 64], sizes = [8, 32], strides = [1, 1]} : vector<8x128xf32> to vector<8x32xf32>
    %317 = vector.extract_strided_slice %313 {offsets = [0, 96], sizes = [8, 32], strides = [1, 1]} : vector<8x128xf32> to vector<8x32xf32>
    %318 = arith.mulf %315, %297 : vector<8x32xf32>
    %319 = arith.mulf %314, %316 : vector<8x32xf32>
    %320 = arith.addf %318, %319 : vector<8x32xf32>
    %321 = math.tanh %320 : vector<8x32xf32>
    %322 = arith.mulf %317, %321 : vector<8x32xf32>
    %c8_i32_161 = arith.constant 8 : i32
    %323 = arith.truncf %322 : vector<8x32xf32> to vector<8x32xbf16>
    %c0_162 = arith.constant 0 : index
    %c0_163 = arith.constant 0 : index
    %324 = vector.load %arg3[%c0_162, %c0_163] : memref<32x128xbf16, #tpu.memory_space<vmem>>, vector<32x128xbf16>
    %cst_164 = arith.constant dense<0.000000e+00> : vector<8x128xf32>
    %325 = tpu.matmul %323, %324, %cst_164 {dimension_numbers = #tpu.dot_dimension_numbers<[1], [0], [0], [1], [0, 0, 1, 1], [], []>} : vector<8x32xbf16>, vector<32x128xbf16>, vector<8x128xf32> -> vector<8x128xf32>
    %c0_165 = arith.constant 0 : index
    %c0_166 = arith.constant 0 : index
    %326 = vector.load %arg4[%c0_165, %c0_166] : memref<1x128xf32, #tpu.memory_space<vmem>>, vector<1x128xf32>
    %327 = vector.broadcast %326 : vector<1x128xf32> to vector<8x128xf32>
    %328 = arith.addf %325, %327 : vector<8x128xf32>
    %c0_167 = arith.constant 0 : index
    %c0_168 = arith.constant 0 : index
    %329 = vector.load %arg5[%c0_167, %c0_168] : memref<8x128xf32, #tpu.memory_space<vmem>>, vector<8x128xf32>
    tpu.vector_store %arg5[%c0_167, %c0_168], %328 {strides = array<i32>} : memref<8x128xf32, #tpu.memory_space<vmem>>, vector<8x128xf32>,
    return
  }
}

</mosaic_0001>

<bundles_post_ra>
// kernel: forward.1
= control target key start
LH: loop header
LB: loop body
LE: loop exit
PB: predicated region body
PF: predicated region fallthrough
CT: control target
= control target key end

     0   :  { %10 = vsyncpa [#allocation5], 0  ;;  %s1423_s0 = inlined_call_operand.vmem [shape: s32[4,8], index: 0, kind: input, shape index: {}]   ;;  %s1424_s1 = inlined_call_operand.hbm [shape: f32[56,128], index: 1, kind: input, shape index: {}]   ;;  %s1425_s2 = inlined_call_operand.hbm [shape: bf16[32,128], index: 2, kind: input, shape index: {}]   ;;  %s1426_s3 = inlined_call_operand.vmem [shape: bf16[32,128], index: 3, kind: input, shape index: {}]   ;;  %s1427_s4 = inlined_call_operand.vmem [shape: f32[1,128], index: 4, kind: input, shape index: {}]   ;;  %s1428_s5 = inlined_call_operand.vmem [shape: f32[8,128], index: 5, kind: output, shape index: {}]  }
   0x1   :  { %11 = vsyncpa [#allocation4], 0  ;;  %s19_s20 = sshll.u32 %s1423_s0, 4  ;;  %s20_s20 = int_to_ptr.vmem [resolvable:$true] %s19_s20 }
   0x2   :  { %12 = vsyncpa [#allocation8], 0  ;;  %s1155_s21 = scalar_lea.vmem %s20_s20, 64  ;;  %p1160_p1 = scmp.lt.s32.totalorder %s20_s20, %s20_s20 }
   0x3   :  { %p1156_p0 = scmp.ne.s32.totalorder %s20_s20, %s1155_s21  ;;  %p1161_p2 = scmp.lt.s32.totalorder %s1155_s21, %s1155_s21 }
   0x5   :  { %p1162_p3 = por %p1161_p2, %p1160_p1 }
   0x7   :  { %p1163_p4 = pnand %p1162_p3, %p1156_p0 }
   0x9   :  { %1166 = shalt.err (!%p1163_p4)
}
   0xa   :  { %s1217_s22 = smov [#allocation3]   ;;  %s1218_s23 = smov [#allocation6]  }
   0xb   :  { %22 = dma.vmem_to_smem %s20_s20, 64, %s1217_s22, [#allocation5]  }
   0xc   :  { %s28_s24 = sshll.u32 %s1218_s23, 4  ;;  %s1167_s27 = scalar_lea.hbm %s1424_s1, 896  ;;  %s29_s24 = int_to_ptr.vmem [resolvable:$true] %s28_s24 }
   0xd   :  { %p1168_p5 = scmp.ne.s32.totalorder %s1424_s1, %s1167_s27  ;;  %p1171_p6 = scmp.lt.u32.totalorder %s1167_s27, %s1424_s1 }
   0xf   :  { %p1173_p7 = pnand %p1171_p6, %p1168_p5 }
  0x11   :  { %1176 = shalt.err (!%p1173_p7)
}
  0x12   :  { %s1177_s6 = scalar_lea.vmem %s29_s24, 896  ;;  %p1182_p9 = scmp.lt.s32.totalorder %s29_s24, %s29_s24 }
  0x13   :  { %p1178_p8 = scmp.ne.s32.totalorder %s29_s24, %s1177_s6  ;;  %p1183_p10 = scmp.lt.s32.totalorder %s1177_s6, %s1177_s6 }
  0x15   :  { %p1184_p11 = por %p1183_p10, %p1182_p9 }
  0x17   :  { %p1185_p12 = pnand %p1184_p11, %p1178_p8 }
  0x19   :  { %1188 = shalt.err (!%p1185_p12)
}
  0x1a   :  { %s1219_s7 = smov 128   ;;  %s1220_s8 = smov 8  }
  0x1b   :  { %34 = dma.hbm_to_vmem [thread:$0]  %s1424_s1, 896, %s29_s24, [#allocation4], %s1219_s7, %s1219_s7, %s1220_s8  }
  0x1c   :  { %s1221_s11 = smov [#allocation7]   ;;  %s1189_s15 = scalar_lea.hbm %s1425_s2, 256 }
  0x1d   :  { %s40_s12 = sshll.u32 %s1221_s11, 4  ;;  %p1190_p13 = scmp.ne.s32.totalorder %s1425_s2, %s1189_s15  ;;  %s41_s12 = int_to_ptr.vmem [resolvable:$true] %s40_s12 }
  0x1e   :  { %p1193_p0 = scmp.lt.u32.totalorder %s1189_s15, %s1425_s2 }
  0x20   :  { %p1195_p1 = pnand %p1193_p0, %p1190_p13 }
  0x22   :  { %1198 = shalt.err (!%p1195_p1)
}
  0x23   :  { %s1199_s20 = scalar_lea.vmem %s41_s12, 256  ;;  %p1204_p3 = scmp.lt.s32.totalorder %s41_s12, %s41_s12 }
  0x24   :  { %p1200_p2 = scmp.ne.s32.totalorder %s41_s12, %s1199_s20  ;;  %p1205_p4 = scmp.lt.s32.totalorder %s1199_s20, %s1199_s20 }
  0x26   :  { %p1206_p5 = por %p1205_p4, %p1204_p3 }
  0x28   :  { %p1207_p6 = pnand %p1206_p5, %p1200_p2 }
  0x2a   :  { %1210 = shalt.err (!%p1207_p6)
}
  0x2b   :  { %s1222_s1 = smov 64   ;;  %s1223_s21 = smov 4  }
  0x2c   :  { %46 = dma.hbm_to_vmem [thread:$0]  %s1425_s2, 256, %s41_s12, [#allocation8], %s1222_s1, %s1222_s1, %s1223_s21  }
  0x2d   :  { %1211 = dma.done.wait [#allocation5], 64  }
  0x2e   :  { %1212 = vsyncadd [#allocation5], 4294967232 }
  0x2f   :  { %1213 = dma.done.wait [#allocation4], 896  }
  0x30   :  { %1214 = vsyncadd [#allocation4], 4294966400 }
  0x31   :  { %1215 = dma.done.wait [#allocation8], 256  }
  0x32   :  { %1216 = vsyncadd [#allocation8], 4294967040 }
  0x33   :  { %60 = sfence }
  0x34   :  { %v1287_v0 = vld [vmem:[#allocation7] sm:$0xff]   ;;  %v1224_v1 = vmov 0.0   ;;  %v1300_v2 = vld [vmem:[#allocation7 + $0x8] sm:$0xff]   ;;  %vm1225_vm0 = vmmov 0   ;;  %s70_s2 = sld [smem:[#allocation3]]  ;;  %s925_s24 = sld [smem:[#allocation3 + $0x1]]  ;;  %v202_v16 = vlaneseq }
  0x35   :  { %1004 = vmatprep.subr.bf16.mxu0 %v1224_v1  ;;  %62 = vst [vmem:[#allocation2] sm:$0xff] %v1224_v1  ;;  %63 = vst [vmem:[#allocation2 + $0x8] sm:$0xff] %v1224_v1  ;;  %1012 = vmatprep.subr.bf16.mxu1 %v1224_v1  ;;  %s926_s25 = sld [smem:[#allocation3 + $0x2]]  ;;  %s927_s26 = sld [smem:[#allocation3 + $0x3]]  ;;  %v1226_v3 = vmov 0   ;;  %vm220_vm4 = vcmask 261120  }
  0x36   :  { %64 = vst [vmem:[#allocation2 + $0x10] sm:$0xff] %v1224_v1  ;;  %65 = vst [vmem:[#allocation2 + $0x18] sm:$0xff] %v1224_v1  ;;  %1005 = vmatpush3.bf16.msra.mxu0 %v1287_v0  ;;  %1008 = vmatprep.mubr.msk.bf16.mxu0 %vm1225_vm0, %v1224_v1  ;;  %v203_v18 = vand.u32 127, %v202_v16  ;;  %s1227_s30 = smov 32   ;;  %s928_s6 = sld [smem:[#allocation3 + $0x4]]  ;;  %v1090_v19 = vld [vmem:[%s1426_s3 + $0x8] sm:$0xff]  }
  0x37   :  { %66 = vst [vmem:[#allocation2 + $0x20] sm:$0xff] %v1224_v1  ;;  %67 = vst [vmem:[#allocation2 + $0x28] sm:$0xff] %v1224_v1  ;;  %1006 = vmatprep.subr.bf16.mxu0 %v1224_v1  ;;  %1013 = vmatpush3.bf16.msra.mxu1 %v1287_v0  ;;  %s929_s7 = sld [smem:[#allocation3 + $0x5]]  ;;  %s930_s8 = sld [smem:[#allocation3 + $0x6]] }
  0x38   :  { %68 = vst [vmem:[#allocation2 + $0x30] sm:$0xff] %v1224_v1  ;;  %69 = vst [vmem:[#allocation2 + $0x38] sm:$0xff] %v1224_v1  ;;  %1014 = vmatprep.subr.bf16.mxu1 %v1224_v1  ;;  %1016 = vmatprep.mubr.msk.bf16.mxu1 %vm1225_vm0, %v1224_v1  ;;  %vm204_vm1 = vcmp.ge.s32.totalorder %v203_v18, 64  ;;  %vm205_vm2 = vcmp.lt.s32.totalorder %v203_v18, 96  ;;  %s931_s9 = sld [smem:[#allocation3 + $0x7]]  ;;  %s932_s14 = sld [smem:[#allocation3 + $0x80]] }
  0x39   :  { %vm1319_vm3 = vmand %vm204_vm1, %vm205_vm2  ;;  %s933_s15 = sld [smem:[#allocation3 + $0x81]]  ;;  %s934_s16 = sld [smem:[#allocation3 + $0x82]] }
  0x3a   :  { %1007 = vmatpush3.bf16.msra.mxu0 %v1300_v2  ;;  %s71_s27 = scalar_lea.vmem [#allocation6], %s70_s2  ;;  %s75_s28 = scalar_lea.vmem [#allocation6], %s925_s24 }
  0x3b   :  { %1015 = vmatpush3.bf16.msra.mxu1 %v1300_v2  ;;  %1020 = vmatprep.subr.bf16.mxu0 %v1224_v1  ;;  %v72_v4 = vld [vmem:[%s71_s27] sm:$0x1]  ;;  %s79_s0 = scalar_lea.vmem [#allocation6], %s926_s25  ;;  %s83_s29 = scalar_lea.vmem [#allocation6], %s927_s26 }
  0x3c   :  { %1028 = vmatprep.subr.bf16.mxu1 %v1224_v1  ;;  %v76_v5 = vld [vmem:[%s75_s28] sm:$0x1]  ;;  %73 = vst [vmem:[#allocation2] sm:$0x1] %v72_v4  ;;  %s87_s10 = scalar_lea.vmem [#allocation6], %s928_s6  ;;  %s935_s17 = sld [smem:[#allocation3 + $0x83]] }
  0x3d   :  { %1009 = vmatmul.mubr.bf16.vlgmr.msra.gmra.mrb[0].mxu0 %v1226_v3  ;;  %77 = vst [vmem:[#allocation2 + $0x1] sm:$0x1] %v76_v5  ;;  %v80_v6 = vld [vmem:[%s79_s0] sm:$0x1]  ;;  %s91_s11 = scalar_lea.vmem [#allocation6], %s929_s7  ;;  %s95_s12 = scalar_lea.vmem [#allocation6], %s930_s8 }
  0x3e   :  { %v84_v7 = vld [vmem:[%s83_s29] sm:$0x1]  ;;  %1021 = vmatpush3.bf16.msra.mxu0 %v1287_v0  ;;  %1024 = vmatprep.mubr.msk.bf16.mxu0 %vm1225_vm0, %v1224_v1  ;;  %81 = vst [vmem:[#allocation2 + $0x2] sm:$0x1] %v80_v6  ;;  %s99_s13 = scalar_lea.vmem [#allocation6], %s931_s9  ;;  %s103_s18 = scalar_lea.vmem [#allocation6], %s932_s14 }
  0x3f   :  { %85 = vst [vmem:[#allocation2 + $0x3] sm:$0x1] %v84_v7  ;;  %1022 = vmatprep.subr.bf16.mxu0 %v1224_v1  ;;  %v88_v29 = vld [vmem:[%s87_s10] sm:$0x1]  ;;  %s107_s19 = scalar_lea.vmem [#allocation6], %s933_s15  ;;  %s111_s20 = scalar_lea.vmem [#allocation6], %s934_s16 }
  0x40   :  { %v92_v30 = vld [vmem:[%s91_s11] sm:$0x1]  ;;  %89 = vst [vmem:[#allocation2 + $0x8] sm:$0x1] %v88_v29  ;;  %s936_s22 = sld [smem:[#allocation3 + $0x84]]  ;;  %s937_s23 = sld [smem:[#allocation3 + $0x85]] }
  0x41   :  { %93 = vst [vmem:[#allocation2 + $0x9] sm:$0x1] %v92_v30  ;;  %v96_v32 = vld [vmem:[%s95_s12] sm:$0x1]  ;;  %s938_s2 = sld [smem:[#allocation3 + $0x86]]  ;;  %s939_s24 = sld [smem:[#allocation3 + $0x87]] }
  0x42   :  { %1023 = vmatpush3.bf16.msra.mxu0 %v1300_v2  ;;  %v100_v33 = vld [vmem:[%s99_s13] sm:$0x1]  ;;  %97 = vst [vmem:[#allocation2 + $0xa] sm:$0x1] %v96_v32  ;;  %s115_s21 = scalar_lea.vmem [#allocation6], %s935_s17  ;;  %s940_s0 = sld [smem:[#allocation3 + $0x100]] }
  0x43   :  { %1036 = vmatprep.subr.bf16.mxu0 %v1224_v1  ;;  %101 = vst [vmem:[#allocation2 + $0xb] sm:$0x1] %v100_v33  ;;  %v104_v55 = vld [vmem:[%s103_s18] sm:$0x1]  ;;  %s941_s29 = sld [smem:[#allocation3 + $0x101]]  ;;  %s942_s6 = sld [smem:[#allocation3 + $0x102]] }
  0x44   :  { %v108_v56 = vld [vmem:[%s107_s19] sm:$0x1]  ;;  %105 = vst [vmem:[#allocation2 + $0x10] sm:$0x1] %v104_v55  ;;  %s943_s7 = sld [smem:[#allocation3 + $0x103]]  ;;  %s944_s12 = sld [smem:[#allocation3 + $0x104]] }
  0x45   :  { %109 = vst [vmem:[#allocation2 + $0x11] sm:$0x1] %v108_v56  ;;  %v112_v58 = vld [vmem:[%s111_s20] sm:$0x1]  ;;  %s945_s13 = sld [smem:[#allocation3 + $0x105]]  ;;  %s946_s14 = sld [smem:[#allocation3 + $0x106]] }
  0x46   :  { %v207_v8 = vld [vmem:[#allocation2] sm:$0xff]  ;;  %113 = vst [vmem:[#allocation2 + $0x12] sm:$0x1] %v112_v58  ;;  %s119_s25 = scalar_lea.vmem [#allocation6], %s936_s22  ;;  %s123_s26 = scalar_lea.vmem [#allocation6], %s937_s23 }
  0x47   :  { %v116_v59 = vld [vmem:[%s115_s21] sm:$0x1]  ;;  %s127_s27 = scalar_lea.vmem [#allocation6], %s938_s2  ;;  %s131_s28 = scalar_lea.vmem [#allocation6], %s939_s24 }
  0x48   :  { %117 = vst [vmem:[#allocation2 + $0x13] sm:$0x1] %v116_v59  ;;  %s135_s8 = scalar_lea.vmem [#allocation6], %s940_s0  ;;  %s947_s15 = sld [smem:[#allocation3 + $0x107]] }
  0x49   :  { %s139_s9 = scalar_lea.vmem [#allocation6], %s941_s29  ;;  %s143_s10 = scalar_lea.vmem [#allocation6], %s942_s6 }
  0x4a   :  { %v291_v37 = vld [vmem:[#allocation2 + $0x8] sm:$0xff]  ;;  %s147_s11 = scalar_lea.vmem [#allocation6], %s943_s7  ;;  %s151_s16 = scalar_lea.vmem [#allocation6], %s944_s12 }
  0x4b   :  { %s155_s17 = scalar_lea.vmem [#allocation6], %s945_s13  ;;  %s159_s18 = scalar_lea.vmem [#allocation6], %s946_s14 }
  0x4c   :  { %s948_s20 = sld [smem:[#allocation3 + $0x180]]  ;;  %s949_s21 = sld [smem:[#allocation3 + $0x181]] }
  0x4d   :  { %s950_s22 = sld [smem:[#allocation3 + $0x182]]  ;;  %s951_s23 = sld [smem:[#allocation3 + $0x183]] }
  0x4e   :  { %s163_s19 = scalar_lea.vmem [#allocation6], %s947_s15  ;;  %s954_s0 = sld [smem:[#allocation3 + $0x186]] }
  0x4f   :  { %v366_v63 = vld [vmem:[#allocation2 + $0x10] sm:$0xff]  ;;  %s955_s29 = sld [smem:[#allocation3 + $0x187]] }
  0x52   :  { %s167_s2 = scalar_lea.vmem [#allocation6], %s948_s20  ;;  %s171_s24 = scalar_lea.vmem [#allocation6], %s949_s21 }
 0x110   :  { %v258_v9 = vpop.f32.mrb[0].mxu0 }
 0x111   :  { %v264_v10 = vadd.f32 %v258_v9, %v207_v8  ;;  %v1010_v11 = vpop.f32.mrb[1].mxu0 }
 0x112   :  { %v261_v12 = vpop.f32.mrb[2].mxu0 }
 0x113   :  { %v958_v13 = vmul.f32 -1.442695, %v264_v10  ;;  %v1011_v14 = vpop.f32.mrb[3].mxu0 }
 0x115   :  { %1091 = vpow2.f32 %v958_v13 }
 0x116   :  { %1093 = vtanh.f32 %v264_v10 }
 0x11f   :  { %v1092_v15 = vpop.eup %1091 }
 0x120   :  { %v268_v17 = vadd.f32 1.0, %v1092_v15  ;;  %v1094_v20 = vpop.eup %1093 }
 0x122   :  { %1095 = vrcp.f32 %v268_v17 }
 0x12c   :  { %v1096_v21 = vpop.eup %1095 }
 0x12d   :  { %v272_v22 = vsel %vm1319_vm3, %v1094_v20, %v1096_v21  ;;  %v120_v21 = vld [vmem:[%s119_s25] sm:$0x1]  ;;  %s175_s25 = scalar_lea.vmem [#allocation6], %s950_s22 }
 0x12e   :  { %275 = vrot.lane.b32.xlu0 %v272_v22, %s1222_s1  ;;  %v273_v25 = vmul.f32 0.0, %v272_v22  ;;  %121 = vst [vmem:[#allocation2 + $0x18] sm:$0x1] %v120_v21 }
 0x1a0   :  { %v276_v23 = vpop.permute.xlu0 %275 }
 0x1a1   :  { %v278_v24 = vmul.f32 %v276_v23, %v272_v22 }
 0x1a3   :  { %280 = vrot.lane.b32.xlu0 %v278_v24, %s1227_s30  ;;  %v128_v24 = vld [vmem:[%s127_s27] sm:$0x1]  ;;  %s952_s27 = sld [smem:[#allocation3 + $0x184]] }
 0x1a4   :  { %129 = vst [vmem:[#allocation2 + $0x1a] sm:$0x1] %v128_v24 }
 0x1a9   :  { %s183_s6 = scalar_lea.vmem [#allocation6], %s952_s27 }
 0x215   :  { %v281_v26 = vpop.permute.xlu0 %280 }
 0x216   :  { %v283_v27 = vadd.f32 %v281_v26, %v273_v25  ;;  %v132_v25 = vld [vmem:[%s131_s28] sm:$0x1]  ;;  %s953_s28 = sld [smem:[#allocation3 + $0x185]] }
 0x217   :  { %133 = vst [vmem:[#allocation2 + $0x1b] sm:$0x1] %v132_v25 }
 0x218   :  { %1097 = vtanh.f32 %v283_v27 }
 0x21c   :  { %s187_s7 = scalar_lea.vmem [#allocation6], %s953_s28 }
 0x222   :  { %v1098_v28 = vpop.eup %1097 }
 0x223   :  { %286 = vrot.lane.b32.xlu1 %v1098_v28, %s1222_s1 }
 0x295   :  { %v287_v31 = vpop.permute.xlu1 %286 }
 0x296   :  { %v289_v34 = vmul.f32 %v287_v31, %v272_v22  ;;  %v124_v22 = vld [vmem:[%s123_s26] sm:$0x1]  ;;  %s179_s26 = scalar_lea.vmem [#allocation6], %s951_s23 }
 0x297   :  { %125 = vst [vmem:[#allocation2 + $0x19] sm:$0x1] %v124_v22 }
 0x298   :  { %v292_v35 = vpack.c.bf16 %v289_v34, %v289_v34 }
 0x29a   :  { %294 = vrot.lane.b32.xlu1 %v292_v35, %s1227_s30 }
 0x29e   :  { %v441_v29 = vld [vmem:[#allocation2 + $0x18] sm:$0xff] }
 0x30c   :  { %v295_v36 = vpop.permute.xlu1 %294 }
 0x30d   :  { %1017 = vmatmul.mubr.msk.bf16.vlgmr.msra.gmra.mrb[0].mxu1 %vm220_vm4, %v295_v36 }
 0x30e   :  { %1029 = vmatpush3.bf16.msra.mxu1 %v1287_v0  ;;  %1032 = vmatprep.mubr.msk.bf16.mxu1 %vm1225_vm0, %v1224_v1 }
 0x30f   :  { %1030 = vmatprep.subr.bf16.mxu1 %v1224_v1 }
 0x312   :  { %1031 = vmatpush3.bf16.msra.mxu1 %v1300_v2 }
 0x313   :  { %1044 = vmatprep.subr.bf16.mxu1 %v1224_v1 }
 0x3e0   :  { %v333_v38 = vpop.f32.mrb[0].mxu1 }
 0x3e1   :  { %v339_v39 = vadd.f32 %v333_v38, %v291_v37  ;;  %v1018_v40 = vpop.f32.mrb[1].mxu1 }
 0x3e2   :  { %v336_v41 = vpop.f32.mrb[2].mxu1 }
 0x3e3   :  { %v960_v42 = vmul.f32 -1.442695, %v339_v39  ;;  %v1019_v43 = vpop.f32.mrb[3].mxu1 }
 0x3e5   :  { %1099 = vpow2.f32 %v960_v42 }
 0x3e6   :  { %1101 = vtanh.f32 %v339_v39 }
 0x3ef   :  { %v1100_v44 = vpop.eup %1099 }
 0x3f0   :  { %v343_v45 = vadd.f32 1.0, %v1100_v44  ;;  %v1102_v46 = vpop.eup %1101 }
 0x3f2   :  { %1103 = vrcp.f32 %v343_v45 }
 0x3fc   :  { %v1104_v47 = vpop.eup %1103 }
 0x3fd   :  { %v347_v48 = vsel %vm1319_vm3, %v1102_v46, %v1104_v47  ;;  %v136_v47 = vld [vmem:[%s135_s8] sm:$0x1]  ;;  %s191_s8 = scalar_lea.vmem [#allocation6], %s954_s0 }
 0x3fe   :  { %350 = vrot.lane.b32.xlu0 %v347_v48, %s1222_s1  ;;  %v348_v51 = vmul.f32 %v347_v48, %v283_v27  ;;  %137 = vst [vmem:[#allocation2 + $0x20] sm:$0x1] %v136_v47 }
 0x470   :  { %v351_v49 = vpop.permute.xlu0 %350 }
 0x471   :  { %v353_v50 = vmul.f32 %v351_v49, %v347_v48 }
 0x473   :  { %355 = vrot.lane.b32.xlu1 %v353_v50, %s1227_s30  ;;  %v144_v50 = vld [vmem:[%s143_s10] sm:$0x1] }
 0x474   :  { %145 = vst [vmem:[#allocation2 + $0x22] sm:$0x1] %v144_v50 }
 0x4e5   :  { %v356_v52 = vpop.permute.xlu1 %355 }
 0x4e6   :  { %v358_v53 = vadd.f32 %v356_v52, %v348_v51  ;;  %v148_v51 = vld [vmem:[%s147_s11] sm:$0x1] }
 0x4e7   :  { %149 = vst [vmem:[#allocation2 + $0x23] sm:$0x1] %v148_v51 }
 0x4e8   :  { %1105 = vtanh.f32 %v358_v53 }
 0x4f2   :  { %v1106_v54 = vpop.eup %1105 }
 0x4f3   :  { %361 = vrot.lane.b32.xlu0 %v1106_v54, %s1222_s1 }
 0x565   :  { %v362_v57 = vpop.permute.xlu0 %361 }
 0x566   :  { %v364_v60 = vmul.f32 %v362_v57, %v347_v48  ;;  %v140_v48 = vld [vmem:[%s139_s9] sm:$0x1]  ;;  %s195_s9 = scalar_lea.vmem [#allocation6], %s955_s29 }
 0x567   :  { %141 = vst [vmem:[#allocation2 + $0x21] sm:$0x1] %v140_v48 }
 0x568   :  { %v367_v61 = vpack.c.bf16 %v364_v60, %v364_v60 }
 0x56a   :  { %369 = vrot.lane.b32.xlu1 %v367_v61, %s1227_s30 }
 0x56e   :  { %v516_v55 = vld [vmem:[#allocation2 + $0x20] sm:$0xff] }
 0x5dc   :  { %v370_v62 = vpop.permute.xlu1 %369 }
 0x5dd   :  { %1025 = vmatmul.mubr.msk.bf16.vlgmr.msra.gmra.mrb[4].mxu0 %vm220_vm4, %v370_v62 }
 0x5de   :  { %1037 = vmatpush3.bf16.msra.mxu0 %v1287_v0  ;;  %1040 = vmatprep.mubr.msk.bf16.mxu0 %vm1225_vm0, %v1224_v1 }
 0x5df   :  { %1038 = vmatprep.subr.bf16.mxu0 %v1224_v1 }
 0x5e2   :  { %1039 = vmatpush3.bf16.msra.mxu0 %v1300_v2 }
 0x5e3   :  { %1052 = vmatprep.subr.bf16.mxu0 %v1224_v1 }
 0x6b0   :  { %v408_v3 = vpop.f32.mrb[4].mxu0 }
 0x6b1   :  { %v414_v4 = vadd.f32 %v408_v3, %v366_v63  ;;  %v1026_v5 = vpop.f32.mrb[5].mxu0 }
 0x6b2   :  { %v411_v6 = vpop.f32.mrb[6].mxu0 }
 0x6b3   :  { %v962_v7 = vmul.f32 -1.442695, %v414_v4  ;;  %v1027_v8 = vpop.f32.mrb[7].mxu0 }
 0x6b5   :  { %1107 = vpow2.f32 %v962_v7 }
 0x6b6   :  { %1109 = vtanh.f32 %v414_v4 }
 0x6bf   :  { %v1108_v9 = vpop.eup %1107 }
 0x6c0   :  { %v418_v10 = vadd.f32 1.0, %v1108_v9  ;;  %v1110_v11 = vpop.eup %1109 }
 0x6c2   :  { %1111 = vrcp.f32 %v418_v10 }
 0x6cc   :  { %v1112_v12 = vpop.eup %1111 }
 0x6cd   :  { %v422_v13 = vsel %vm1319_vm3, %v1110_v11, %v1112_v12  ;;  %v152_v12 = vld [vmem:[%s151_s16] sm:$0x1] }
 0x6ce   :  { %425 = vrot.lane.b32.xlu0 %v422_v13, %s1222_s1  ;;  %v423_v16 = vmul.f32 %v422_v13, %v358_v53  ;;  %153 = vst [vmem:[#allocation2 + $0x28] sm:$0x1] %v152_v12 }
 0x740   :  { %v426_v14 = vpop.permute.xlu0 %425 }
 0x741   :  { %v428_v15 = vmul.f32 %v426_v14, %v422_v13 }
 0x743   :  { %430 = vrot.lane.b32.xlu1 %v428_v15, %s1227_s30  ;;  %v160_v15 = vld [vmem:[%s159_s18] sm:$0x1] }
 0x744   :  { %161 = vst [vmem:[#allocation2 + $0x2a] sm:$0x1] %v160_v15 }
 0x7b5   :  { %v431_v17 = vpop.permute.xlu1 %430 }
 0x7b6   :  { %v433_v18 = vadd.f32 %v431_v17, %v423_v16  ;;  %v164_v16 = vld [vmem:[%s163_s19] sm:$0x1] }
 0x7b7   :  { %165 = vst [vmem:[#allocation2 + $0x2b] sm:$0x1] %v164_v16 }
 0x7b8   :  { %1113 = vtanh.f32 %v433_v18 }
 0x7c2   :  { %v1114_v20 = vpop.eup %1113 }
 0x7c3   :  { %436 = vrot.lane.b32.xlu0 %v1114_v20, %s1222_s1 }
 0x835   :  { %v437_v23 = vpop.permute.xlu0 %436 }
 0x836   :  { %v439_v26 = vmul.f32 %v437_v23, %v422_v13  ;;  %v156_v13 = vld [vmem:[%s155_s17] sm:$0x1] }
 0x837   :  { %157 = vst [vmem:[#allocation2 + $0x29] sm:$0x1] %v156_v13 }
 0x838   :  { %v442_v27 = vpack.c.bf16 %v439_v26, %v439_v26 }
 0x83a   :  { %444 = vrot.lane.b32.xlu1 %v442_v27, %s1227_s30 }
 0x83e   :  { %v591_v21 = vld [vmem:[#allocation2 + $0x28] sm:$0xff] }
 0x8ac   :  { %v445_v28 = vpop.permute.xlu1 %444 }
 0x8ad   :  { %1033 = vmatmul.mubr.msk.bf16.vlgmr.msra.gmra.mrb[4].mxu1 %vm220_vm4, %v445_v28 }
 0x8ae   :  { %1045 = vmatpush3.bf16.msra.mxu1 %v1287_v0  ;;  %1048 = vmatprep.mubr.msk.bf16.mxu1 %vm1225_vm0, %v1224_v1 }
 0x8af   :  { %1046 = vmatprep.subr.bf16.mxu1 %v1224_v1 }
 0x8b2   :  { %1047 = vmatpush3.bf16.msra.mxu1 %v1300_v2 }
 0x8b3   :  { %1060 = vmatprep.subr.bf16.mxu1 %v1224_v1 }
 0x980   :  { %v483_v30 = vpop.f32.mrb[4].mxu1 }
 0x981   :  { %v489_v31 = vadd.f32 %v483_v30, %v441_v29  ;;  %v1034_v32 = vpop.f32.mrb[5].mxu1 }
 0x982   :  { %v486_v33 = vpop.f32.mrb[6].mxu1 }
 0x983   :  { %v964_v34 = vmul.f32 -1.442695, %v489_v31  ;;  %v1035_v35 = vpop.f32.mrb[7].mxu1 }
 0x985   :  { %1115 = vpow2.f32 %v964_v34 }
 0x986   :  { %1117 = vtanh.f32 %v489_v31 }
 0x98f   :  { %v1116_v36 = vpop.eup %1115 }
 0x990   :  { %v493_v37 = vadd.f32 1.0, %v1116_v36  ;;  %v1118_v38 = vpop.eup %1117 }
 0x992   :  { %1119 = vrcp.f32 %v493_v37  ;;  %v168_v37 = vld [vmem:[%s167_s2] sm:$0x1] }
 0x993   :  { %169 = vst [vmem:[#allocation2 + $0x30] sm:$0x1] %v168_v37 }
 0x99c   :  { %v1120_v39 = vpop.eup %1119 }
 0x99d   :  { %v497_v40 = vsel %vm1319_vm3, %v1118_v38, %v1120_v39  ;;  %v172_v38 = vld [vmem:[%s171_s24] sm:$0x1] }
 0x99e   :  { %500 = vrot.lane.b32.xlu0 %v497_v40, %s1222_s1  ;;  %v498_v43 = vmul.f32 %v497_v40, %v433_v18  ;;  %173 = vst [vmem:[#allocation2 + $0x31] sm:$0x1] %v172_v38 }
 0xa10   :  { %v501_v41 = vpop.permute.xlu0 %500 }
 0xa11   :  { %v503_v42 = vmul.f32 %v501_v41, %v497_v40  ;;  %v180_v41 = vld [vmem:[%s179_s26] sm:$0x1] }
 0xa12   :  { %181 = vst [vmem:[#allocation2 + $0x33] sm:$0x1] %v180_v41 }
 0xa13   :  { %505 = vrot.lane.b32.xlu1 %v503_v42, %s1227_s30 }
 0xa85   :  { %v506_v44 = vpop.permute.xlu1 %505 }
 0xa86   :  { %v508_v45 = vadd.f32 %v506_v44, %v498_v43 }
 0xa88   :  { %1121 = vtanh.f32 %v508_v45 }
 0xa92   :  { %v1122_v46 = vpop.eup %1121 }
 0xa93   :  { %511 = vrot.lane.b32.xlu0 %v1122_v46, %s1222_s1 }
 0xb05   :  { %v512_v49 = vpop.permute.xlu0 %511 }
 0xb06   :  { %v514_v52 = vmul.f32 %v512_v49, %v497_v40  ;;  %v176_v40 = vld [vmem:[%s175_s25] sm:$0x1] }
 0xb07   :  { %177 = vst [vmem:[#allocation2 + $0x32] sm:$0x1] %v176_v40 }
 0xb08   :  { %v517_v53 = vpack.c.bf16 %v514_v52, %v514_v52 }
 0xb0a   :  { %519 = vrot.lane.b32.xlu1 %v517_v53, %s1227_s30 }
 0xb7c   :  { %v520_v54 = vpop.permute.xlu1 %519 }
 0xb7d   :  { %1041 = vmatmul.mubr.msk.bf16.vlgmr.msra.gmra.mrb[8].mxu0 %vm220_vm4, %v520_v54 }
 0xb7e   :  { %1053 = vmatpush3.bf16.msra.mxu0 %v1287_v0  ;;  %1056 = vmatprep.mubr.msk.bf16.mxu0 %vm1225_vm0, %v1224_v1 }
 0xb7f   :  { %1054 = vmatprep.subr.bf16.mxu0 %v1224_v1 }
 0xb82   :  { %1055 = vmatpush3.bf16.msra.mxu0 %v1300_v2 }
 0xb83   :  { %1068 = vmatprep.subr.bf16.mxu0 %v1224_v1 }
 0xc50   :  { %v558_v56 = vpop.f32.mrb[8].mxu0 }
 0xc51   :  { %v564_v57 = vadd.f32 %v558_v56, %v516_v55  ;;  %v1042_v58 = vpop.f32.mrb[9].mxu0 }
 0xc52   :  { %v561_v59 = vpop.f32.mrb[10].mxu0 }
 0xc53   :  { %v966_v60 = vmul.f32 -1.442695, %v564_v57  ;;  %v1043_v61 = vpop.f32.mrb[11].mxu0 }
 0xc55   :  { %1123 = vpow2.f32 %v966_v60 }
 0xc56   :  { %1125 = vtanh.f32 %v564_v57 }
 0xc5f   :  { %v1124_v62 = vpop.eup %1123 }
 0xc60   :  { %v568_v63 = vadd.f32 1.0, %v1124_v62  ;;  %v1126_v3 = vpop.eup %1125 }
 0xc62   :  { %1127 = vrcp.f32 %v568_v63  ;;  %v184_v63 = vld [vmem:[%s183_s6] sm:$0x1] }
 0xc63   :  { %185 = vst [vmem:[#allocation2 + $0x38] sm:$0x1] %v184_v63 }
 0xc6c   :  { %v1128_v4 = vpop.eup %1127 }
 0xc6d   :  { %v572_v5 = vsel %vm1319_vm3, %v1126_v3, %v1128_v4  ;;  %v188_v3 = vld [vmem:[%s187_s7] sm:$0x1] }
 0xc6e   :  { %575 = vrot.lane.b32.xlu0 %v572_v5, %s1222_s1  ;;  %v573_v8 = vmul.f32 %v572_v5, %v508_v45  ;;  %v666_v45 = vld [vmem:[#allocation2 + $0x30] sm:$0xff]  ;;  %189 = vst [vmem:[#allocation2 + $0x39] sm:$0x1] %v188_v3 }
 0xce0   :  { %v576_v6 = vpop.permute.xlu0 %575 }
 0xce1   :  { %v578_v7 = vmul.f32 %v576_v6, %v572_v5  ;;  %v196_v6 = vld [vmem:[%s195_s9] sm:$0x1] }
 0xce2   :  { %197 = vst [vmem:[#allocation2 + $0x3b] sm:$0x1] %v196_v6 }
 0xce3   :  { %580 = vrot.lane.b32.xlu1 %v578_v7, %s1227_s30 }
 0xd55   :  { %v581_v9 = vpop.permute.xlu1 %580 }
 0xd56   :  { %v583_v10 = vadd.f32 %v581_v9, %v573_v8 }
 0xd58   :  { %1129 = vtanh.f32 %v583_v10 }
 0xd62   :  { %v1130_v11 = vpop.eup %1129 }
 0xd63   :  { %586 = vrot.lane.b32.xlu0 %v1130_v11, %s1222_s1 }
 0xdd5   :  { %v587_v14 = vpop.permute.xlu0 %586 }
 0xdd6   :  { %v589_v17 = vmul.f32 %v587_v14, %v572_v5  ;;  %v192_v5 = vld [vmem:[%s191_s8] sm:$0x1] }
 0xdd7   :  { %193 = vst [vmem:[#allocation2 + $0x3a] sm:$0x1] %v192_v5 }
 0xdd8   :  { %v592_v18 = vpack.c.bf16 %v589_v17, %v589_v17 }
 0xdda   :  { %594 = vrot.lane.b32.xlu1 %v592_v18, %s1227_s30 }
 0xe4c   :  { %v595_v20 = vpop.permute.xlu1 %594 }
 0xe4d   :  { %1049 = vmatmul.mubr.msk.bf16.vlgmr.msra.gmra.mrb[8].mxu1 %vm220_vm4, %v595_v20 }
 0xe4e   :  { %1061 = vmatpush3.bf16.msra.mxu1 %v1287_v0  ;;  %1064 = vmatprep.mubr.msk.bf16.mxu1 %vm1225_vm0, %v1224_v1 }
 0xe4f   :  { %1062 = vmatprep.subr.bf16.mxu1 %v1224_v1 }
 0xe52   :  { %1063 = vmatpush3.bf16.msra.mxu1 %v1300_v2 }
 0xf20   :  { %v633_v22 = vpop.f32.mrb[8].mxu1 }
 0xf21   :  { %v639_v23 = vadd.f32 %v633_v22, %v591_v21  ;;  %v1050_v24 = vpop.f32.mrb[9].mxu1 }
 0xf22   :  { %v636_v25 = vpop.f32.mrb[10].mxu1 }
 0xf23   :  { %v968_v26 = vmul.f32 -1.442695, %v639_v23  ;;  %v1051_v27 = vpop.f32.mrb[11].mxu1 }
 0xf25   :  { %1131 = vpow2.f32 %v968_v26 }
 0xf26   :  { %1133 = vtanh.f32 %v639_v23 }
 0xf2f   :  { %v1132_v28 = vpop.eup %1131 }
 0xf30   :  { %v643_v29 = vadd.f32 1.0, %v1132_v28  ;;  %v1134_v0 = vpop.eup %1133  ;;  %v1089_v28 = vld [vmem:[%s1426_s3] sm:$0xff]  }
 0xf32   :  { %1135 = vrcp.f32 %v643_v29 }
 0xf3c   :  { %v1136_v30 = vpop.eup %1135 }
 0xf3d   :  { %v647_v31 = vsel %vm1319_vm3, %v1134_v0, %v1136_v30 }
 0xf3e   :  { %650 = vrot.lane.b32.xlu0 %v647_v31, %s1222_s1  ;;  %v648_v33 = vmul.f32 %v647_v31, %v583_v10  ;;  %v741_v10 = vld [vmem:[#allocation2 + $0x38] sm:$0xff] }
 0xfb0   :  { %v651_v2 = vpop.permute.xlu0 %650 }
 0xfb1   :  { %v653_v32 = vmul.f32 %v651_v2, %v647_v31 }
 0xfb3   :  { %655 = vrot.lane.b32.xlu1 %v653_v32, %s1227_s30  ;;  %v973_v32 = vld [vmem:[%s1427_s4] ss:$0 sm:$0xff] }
0x1025   :  { %v656_v34 = vpop.permute.xlu1 %655 }
0x1026   :  { %v658_v35 = vadd.f32 %v656_v34, %v648_v33 }
0x1028   :  { %1137 = vtanh.f32 %v658_v35 }
0x1032   :  { %v1138_v36 = vpop.eup %1137 }
0x1033   :  { %661 = vrot.lane.b32.xlu0 %v1138_v36, %s1222_s1 }
0x10a5   :  { %v662_v39 = vpop.permute.xlu0 %661 }
0x10a6   :  { %v664_v42 = vmul.f32 %v662_v39, %v647_v31 }
0x10a8   :  { %v667_v43 = vpack.c.bf16 %v664_v42, %v664_v42 }
0x10aa   :  { %669 = vrot.lane.b32.xlu1 %v667_v43, %s1227_s30 }
0x111c   :  { %v670_v44 = vpop.permute.xlu1 %669 }
0x111d   :  { %1057 = vmatmul.mubr.msk.bf16.vlgmr.msra.gmra.mrb[12].mxu0 %vm220_vm4, %v670_v44 }
0x111e   :  { %1072 = vmatprep.mubr.msk.bf16.mxu0 %vm1225_vm0, %v1224_v1  ;;  %1069 = vmatpush3.bf16.msra.mxu0 %v1089_v28 }
0x111f   :  { %1070 = vmatprep.subr.bf16.mxu0 %v1224_v1 }
0x1122   :  { %1071 = vmatpush3.bf16.msra.mxu0 %v1090_v19 }
0x11f0   :  { %v708_v46 = vpop.f32.mrb[12].mxu0 }
0x11f1   :  { %v714_v47 = vadd.f32 %v708_v46, %v666_v45  ;;  %v1058_v48 = vpop.f32.mrb[13].mxu0 }
0x11f2   :  { %v711_v49 = vpop.f32.mrb[14].mxu0 }
0x11f3   :  { %v970_v50 = vmul.f32 -1.442695, %v714_v47  ;;  %v1059_v51 = vpop.f32.mrb[15].mxu0 }
0x11f5   :  { %1139 = vpow2.f32 %v970_v50 }
0x11f6   :  { %1141 = vtanh.f32 %v714_v47 }
0x11ff   :  { %v1140_v52 = vpop.eup %1139 }
0x1200   :  { %v718_v53 = vadd.f32 1.0, %v1140_v52  ;;  %v1142_v54 = vpop.eup %1141 }
0x1202   :  { %1143 = vrcp.f32 %v718_v53 }
0x120c   :  { %v1144_v55 = vpop.eup %1143 }
0x120d   :  { %v722_v56 = vsel %vm1319_vm3, %v1142_v54, %v1144_v55 }
0x120e   :  { %725 = vrot.lane.b32.xlu0 %v722_v56, %s1222_s1  ;;  %v723_v59 = vmul.f32 %v722_v56, %v658_v35 }
0x1280   :  { %v726_v57 = vpop.permute.xlu0 %725 }
0x1281   :  { %v728_v58 = vmul.f32 %v726_v57, %v722_v56 }
0x1283   :  { %730 = vrot.lane.b32.xlu1 %v728_v58, %s1227_s30 }
0x12f5   :  { %v731_v60 = vpop.permute.xlu1 %730 }
0x12f6   :  { %v733_v61 = vadd.f32 %v731_v60, %v723_v59 }
0x12f8   :  { %1145 = vtanh.f32 %v733_v61 }
0x1302   :  { %v1146_v62 = vpop.eup %1145 }
0x1303   :  { %736 = vrot.lane.b32.xlu0 %v1146_v62, %s1222_s1 }
0x1375   :  { %v737_v4 = vpop.permute.xlu0 %736 }
0x1376   :  { %v739_v7 = vmul.f32 %v737_v4, %v722_v56 }
0x1378   :  { %v742_v8 = vpack.c.bf16 %v739_v7, %v739_v7 }
0x137a   :  { %744 = vrot.lane.b32.xlu1 %v742_v8, %s1227_s30 }
0x13ec   :  { %v745_v9 = vpop.permute.xlu1 %744 }
0x13ed   :  { %1065 = vmatmul.mubr.msk.bf16.vlgmr.msra.gmra.mrb[12].mxu1 %vm220_vm4, %v745_v9 }
0x14c0   :  { %v783_v11 = vpop.f32.mrb[12].mxu1 }
0x14c1   :  { %v789_v12 = vadd.f32 %v783_v11, %v741_v10  ;;  %v1066_v13 = vpop.f32.mrb[13].mxu1 }
0x14c2   :  { %v786_v14 = vpop.f32.mrb[14].mxu1 }
0x14c3   :  { %v972_v15 = vmul.f32 -1.442695, %v789_v12  ;;  %v1067_v16 = vpop.f32.mrb[15].mxu1 }
0x14c5   :  { %1147 = vpow2.f32 %v972_v15 }
0x14c6   :  { %1149 = vtanh.f32 %v789_v12 }
0x14cf   :  { %v1148_v17 = vpop.eup %1147 }
0x14d0   :  { %v793_v18 = vadd.f32 1.0, %v1148_v17  ;;  %v1150_v20 = vpop.eup %1149 }
0x14d2   :  { %1151 = vrcp.f32 %v793_v18 }
0x14dc   :  { %v1152_v21 = vpop.eup %1151 }
0x14dd   :  { %v797_v22 = vsel %vm1319_vm3, %v1150_v20, %v1152_v21 }
0x14de   :  { %800 = vrot.lane.b32.xlu0 %v797_v22, %s1222_s1  ;;  %v798_v25 = vmul.f32 %v797_v22, %v733_v61 }
0x1550   :  { %v801_v23 = vpop.permute.xlu0 %800 }
0x1551   :  { %v803_v24 = vmul.f32 %v801_v23, %v797_v22 }
0x1553   :  { %805 = vrot.lane.b32.xlu1 %v803_v24, %s1227_s30 }
0x15c5   :  { %v806_v26 = vpop.permute.xlu1 %805 }
0x15c6   :  { %v808_v27 = vadd.f32 %v806_v26, %v798_v25 }
0x15c8   :  { %1153 = vtanh.f32 %v808_v27 }
0x15d2   :  { %v1154_v29 = vpop.eup %1153 }
0x15d3   :  { %811 = vrot.lane.b32.xlu0 %v1154_v29, %s1222_s1 }
0x1645   :  { %v812_v0 = vpop.permute.xlu0 %811 }
0x1646   :  { %v814_v30 = vmul.f32 %v812_v0, %v797_v22 }
0x1648   :  { %v815_v31 = vpack.c.bf16 %v814_v30, %v814_v30 }
0x164a   :  { %828 = vrot.lane.b32.xlu1 %v815_v31, %s1227_s30 }
0x16bc   :  { %v829_v2 = vpop.permute.xlu1 %828 }
0x16bd   :  { %1073 = vmatmul.mubr.msk.bf16.vlgmr.msra.gmra.mrb[16].mxu0 %vm220_vm4, %v829_v2 }
0x1790   :  { %v879_v33 = vpop.f32.mrb[16].mxu0 }
0x1791   :  { %v880_v34 = vadd.f32 %v973_v32, %v879_v33  ;;  %v1074_v35 = vpop.f32.mrb[17].mxu0 }
0x1792   :  { %v882_v1 = vpop.f32.mrb[18].mxu0 }
0x1793   :  { %885 = vst [vmem:[%s1428_s5] sm:$0xff] %v880_v34  ;;  %v1075_v36 = vpop.f32.mrb[19].mxu0 }
0x1794   :  { %890 = vsyncpa [#allocation4], 1 }
0x1795   :  { %891 = vsyncpa [#allocation8], 1 }
0x1796   :  { %892 = vsyncpa [#allocation5], 1 }

</bundles_post_ra>
